<compile_context>
chip_gen: v7x
topology: tpu7x:2x2x1
jax: 0.10.0
libtpu: 0.0.40
codegen_flags: <defaults>
</compile_context>

<pallas_src>
import jax
import jax.numpy as jnp
from jax.experimental import pallas as pl
from jax.experimental.pallas import tpu as pltpu


# ------------------------------ Pallas kernel --------------------------------
def _discriminator_kernel(x_ref, wih_ref, whh_ref, proj_ref, bias_ref,
                          out_ref, seq0_ref, seq1_ref):
    TB, Din = x_ref.shape
    H2 = whh_ref.shape[1]          # 2H  (fwd | rev hidden, lane-concatenated)
    H = H2 // 2
    B = out_ref.shape[0]
    T = TB // B

    def mdot(a, b):
        # MXU matmul; operands cast to the (possibly bf16) weight dtype,
        # accumulation always f32.
        return jnp.dot(a.astype(b.dtype), b, preferred_element_type=jnp.float32)

    # ---- hoisted small-operand loads (packed arrays, static slices) ---------
    phi_w = proj_ref[0:Din, :]                      # (Din, 2H), cols H:2H zero
    phi_b = bias_ref[0:1, 0:H2]                     # (1, 2H)
    w_out1_row = proj_ref[Din:Din + 1, :]           # (1, 2H)
    w2sel = proj_ref[Din + 1:Din + 1 + B, 0:TB]     # (B, T*B) = kron(w_out2, I_B)
    b_out1 = bias_ref[5:6, 0:1]
    b_out2 = bias_ref[5:6, 1:2]
    # mask selecting the forward-direction gate columns of the 6H-wide layout
    # [r_f r_r | z_f z_r | n_f n_r]  (precomputed in the wrapper).
    fwd_cols = bias_ref[6:7, :] != 0.0              # (1, 6H) bool

    # ---- phi_x fused over all (t, b): one (T*B, Din) @ (Din, 2H) matmul -----
    # (columns H:2H are zero-padded so layer-0's 2H-wide input matmul needs
    #  no lane slicing; the corresponding W_ih rows are zero as well.)
    xs = jnp.maximum(mdot(x_ref[...], phi_w) + phi_b, 0.0)       # (T*B, 2H)

    # ---- one bidirectional GRU layer, fwd/rev fused per step ----------------
    def bidir_layer(inp, layer, seq_ref):
        # hoisted: batched input-to-hidden gates for ALL steps, both directions
        gi_all = mdot(inp, wih_ref[layer]) + bias_ref[layer + 1:layer + 2, :]
        whh = whh_ref[layer]                         # (2H, 6H) block-diagonal
        bhn = bias_ref[layer + 3:layer + 4, 0:H2]    # (1, 2H)  [b_hn_f | b_hn_r]
        h2 = jnp.zeros((B, H2), jnp.float32)         # [h_f | h_r]

        # TODO(synk): for large T switch this unrolled loop to lax.fori_loop.
        for s in range(T):
            rf = slice(s * B, (s + 1) * B)            # forward chain: time s
            rr = slice((T - 1 - s) * B, (T - s) * B)  # reverse chain: time T-1-s
            gi = jnp.where(fwd_cols, gi_all[rf], gi_all[rr])       # (B, 6H)
            gh = mdot(h2, whh)        # single critical-path MXU op per step
            r2 = jax.nn.sigmoid(gi[:, 0:H2] + gh[:, 0:H2])
            z2 = jax.nn.sigmoid(gi[:, H2:2 * H2] + gh[:, H2:2 * H2])
            n2 = jnp.tanh(gi[:, 2 * H2:3 * H2]
                          + r2 * (gh[:, 2 * H2:3 * H2] + bhn))
            h2 = (1.0 - z2) * n2 + z2 * h2
            # per-step writeback into the VMEM sequence scratch (no concat)
            seq_ref[rf, 0:H] = h2[:, 0:H]            # forward hidden @ time s
            seq_ref[rr, H:H2] = h2[:, H:H2]          # reverse hidden @ time T-1-s
        return seq_ref[...]

    seq0 = bidir_layer(xs, 0, seq0_ref)
    # TODO(synk): nn.GRU inter-layer dropout (p=0.05) is training-mode only;
    # eval-mode identity semantics are implemented here.
    seq1 = bidir_layer(seq0, 1, seq1_ref)

    # out1: ReLU(Linear(2H -> 1)) for all (t, b) rows: VPU multiply + lane sum
    u = jnp.maximum(jnp.sum(seq1 * w_out1_row, axis=-1, keepdims=True)
                    + b_out1, 0.0)                               # (T*B, 1)

    # out2: Linear(T -> 1); kron(w_out2, I_B) contracts over time per batch row
    out_ref[...] = jnp.dot(w2sel, u, preferred_element_type=jnp.float32) + b_out2


# ---------------------- wrapper: pack operands & call -------------------------
def _prepare_kernel_operands(x, p, mxu_dtype):
    """Pure-JAX (outside the kernel) weight fusion / packing / layout prep."""
    B, T, Din = x.shape
    H = p['phi_w'].shape[0]
    H2, H6 = 2 * H, 6 * H
    f32 = jnp.float32

    # time-major rows: row index = t*B + b
    x_tm = jnp.transpose(x, (1, 0, 2)).reshape(T * B, Din).astype(f32)

    def layer_pack(l):
        """Fused weights for one bidirectional layer.

        Gate-column layout (width 6H): [r_f r_r | z_f z_r | n_f n_r].
        W_hh is block-diagonal: h_f rows feed *_f columns, h_r rows feed *_r.
        """
        in_dim = H if l == 0 else H2
        wih = jnp.zeros((H2, H6), f32)
        whh = jnp.zeros((H2, H6), f32)
        bi = jnp.zeros((H6,), f32)
        bhn = jnp.zeros((H2,), f32)
        for d, sfx in enumerate(('', '_rev')):
            Wih = p[f'w_ih_l{l}{sfx}']        # (3H, in_dim), gate order r,z,n
            Whh = p[f'w_hh_l{l}{sfx}']        # (3H, H)
            bih = p[f'b_ih_l{l}{sfx}']
            bhh = p[f'b_hh_l{l}{sfx}']
            for g in range(3):
                cols = slice((2 * g + d) * H, (2 * g + d + 1) * H)
                wih = wih.at[0:in_dim, cols].set(Wih[g * H:(g + 1) * H, :].T)
                whh = whh.at[d * H:(d + 1) * H, cols].set(
                    Whh[g * H:(g + 1) * H, :].T)
                bg = bih[g * H:(g + 1) * H]
                if g < 2:                      # r, z: fold input+hidden biases
                    bg = bg + bhh[g * H:(g + 1) * H]
                bi = bi.at[cols].set(bg)       # n columns: b_in only
            bhn = bhn.at[d * H:(d + 1) * H].set(bhh[2 * H:3 * H])
        return wih, whh, bi, bhn

    wih0, whh0, bi0, bhn0 = layer_pack(0)
    wih1, whh1, bi1, bhn1 = layer_pack(1)
    w_ih_stack = jnp.stack([wih0, wih1]).astype(mxu_dtype)      # (2, 2H, 6H)
    w_hh_stack = jnp.stack([whh0, whh1]).astype(mxu_dtype)      # (2, 2H, 6H)

    # projection pack: phi weight (padded to 2H cols), out1 row, out2 selection
    proj = jnp.zeros((Din + 1 + B, H2), f32)
    proj = proj.at[0:Din, 0:H].set(p['phi_w'].T)
    proj = proj.at[Din, :].set(p['out1_w'].reshape(H2))
    w2sel = jnp.kron(p['out2_w'].reshape(1, T), jnp.eye(B, dtype=f32))
    proj = proj.at[Din + 1:Din + 1 + B, 0:T * B].set(w2sel)

    # bias / constants pack (rows are 6H wide, zero padded)
    bias = jnp.zeros((7, H6), f32)
    bias = bias.at[0, 0:H].set(p['phi_b'])
    bias = bias.at[1, :].set(bi0)
    bias = bias.at[2, :].set(bi1)
    bias = bias.at[3, 0:H2].set(bhn0)
    bias = bias.at[4, 0:H2].set(bhn1)
    bias = bias.at[5, 0].set(p['out1_b'][0])
    bias = bias.at[5, 1].set(p['out2_b'][0])
    fwd_mask = ((jnp.arange(H6) // H) % 2) == 0     # forward-direction columns
    bias = bias.at[6, :].set(fwd_mask.astype(f32))

    return [x_tm, w_ih_stack, w_hh_stack, proj, bias]


def ts_rnn_discriminator(x, params, mxu_dtype=jnp.bfloat16):
    """Full forward pass in one pallas_call (everything VMEM-resident)."""
    ops = _prepare_kernel_operands(x, params, mxu_dtype)
    B, T, _ = x.shape
    H = params['phi_w'].shape[0]
    vmem = pl.BlockSpec(memory_space=pltpu.MemorySpace.VMEM)
    return pl.pallas_call(
        _discriminator_kernel,
        out_shape=jax.ShapeDtypeStruct((B, 1), jnp.float32),
        in_specs=[vmem] * len(ops),
        out_specs=vmem,
        scratch_shapes=[pltpu.VMEM((T * B, 2 * H), jnp.float32),   # layer-0 seq
                        pltpu.VMEM((T * B, 2 * H), jnp.float32)],  # layer-1 seq
    )(*ops)


# ------------------- independent PyTorch-semantics reference ------------------
def reference_forward(x, p):
    """Straightforward (un-restructured) implementation of the module."""
    B, T, Din = x.shape
    H = p['phi_w'].shape[0]
    hp = jax.lax.Precision.HIGHEST
    rdot = lambda a, b: jnp.dot(a, b, precision=hp)

    seq = jnp.maximum(rdot(x.reshape(B * T, Din), p['phi_w'].T)
                      + p['phi_b'], 0.0).reshape(B, T, H)

    def gru_direction(inp, wih, whh, bih, bhh, reverse):
        h = jnp.zeros((B, H), jnp.float32)
        outs = [None] * T
        order = range(T - 1, -1, -1) if reverse else range(T)
        for t in order:
            gi = rdot(inp[:, t, :], wih.T) + bih
            gh = rdot(h, whh.T) + bhh
            r = jax.nn.sigmoid(gi[:, :H] + gh[:, :H])
            z = jax.nn.sigmoid(gi[:, H:2 * H] + gh[:, H:2 * H])
            n = jnp.tanh(gi[:, 2 * H:] + r * gh[:, 2 * H:])
            h = (1.0 - z) * n + z * h
            outs[t] = h
        return jnp.stack(outs, axis=1)               # (B, T, H)

    for l in range(2):
        f = gru_direction(seq, p[f'w_ih_l{l}'], p[f'w_hh_l{l}'],
                          p[f'b_ih_l{l}'], p[f'b_hh_l{l}'], False)
        r = gru_direction(seq, p[f'w_ih_l{l}_rev'], p[f'w_hh_l{l}_rev'],
                          p[f'b_ih_l{l}_rev'], p[f'b_hh_l{l}_rev'], True)
        seq = jnp.concatenate([f, r], axis=-1)       # (B, T, 2H)

    u = jnp.maximum(rdot(seq.reshape(B * T, 2 * H), p['out1_w'].T)
                    + p['out1_b'], 0.0).reshape(B, T)
    return rdot(u, p['out2_w'].T) + p['out2_b']      # (B, 1)


# ---------------------------- parameter setup ---------------------------------
def init_params(key, input_dim, latent_dim, seq_len):
    """PyTorch-shaped params with uniform(-1/sqrt(fan_in), 1/sqrt(fan_in))."""
    H = latent_dim
    keys = iter(jax.random.split(key, 32))

    def u(bound, shape):
        return jax.random.uniform(next(keys), shape, jnp.float32, -bound, bound)

    k_phi = 1.0 / (input_dim ** 0.5)
    k_h = 1.0 / (H ** 0.5)
    p = {
        'phi_w': u(k_phi, (H, input_dim)),
        'phi_b': u(k_phi, (H,)),
    }
    for l, in_dim in ((0, H), (1, 2 * H)):
        for sfx in ('', '_rev'):
            p[f'w_ih_l{l}{sfx}'] = u(k_h, (3 * H, in_dim))
            p[f'w_hh_l{l}{sfx}'] = u(k_h, (3 * H, H))
            p[f'b_ih_l{l}{sfx}'] = u(k_h, (3 * H,))
            p[f'b_hh_l{l}{sfx}'] = u(k_h, (3 * H,))
    k_o1 = 1.0 / ((2 * H) ** 0.5)
    p['out1_w'] = u(k_o1, (1, 2 * H))
    p['out1_b'] = u(k_o1, (1,))
    k_o2 = 1.0 / (seq_len ** 0.5)
    p['out2_w'] = u(k_o2, (1, seq_len))
    p['out2_b'] = u(k_o2, (1,))
    return p


# ---------------------------------- main ---------------------------------------
if __name__ == "__main__":
    B, T, Din, H = 2, 8, 4, 32   # batch, sequence_length, input_dim, latent_dim
    key = jax.random.PRNGKey(0)
    kx, kp = jax.random.split(key)
    x = jax.random.normal(kx, (B, T, Din), jnp.float32)
    params = init_params(kp, Din, H, T)

    ref = reference_forward(x, params)

    # f32 MXU operands: tight check against the PyTorch-semantics reference.
    out_f32 = jax.block_until_ready(
        ts_rnn_discriminator(x, params, mxu_dtype=jnp.float32))
    assert out_f32.shape == (B, 1), out_f32.shape
    assert jnp.allclose(out_f32, ref, atol=1e-3, rtol=1e-3), (out_f32, ref)

    # bf16 MXU operands (v6e/v7x fast path, f32 accumulation & gate math):
    # tolerance relaxed for bf16 operand rounding.
    out_bf16 = jax.block_until_ready(
        ts_rnn_discriminator(x, params, mxu_dtype=jnp.bfloat16))
    assert out_bf16.shape == (B, 1), out_bf16.shape
    assert jnp.allclose(out_bf16, ref, atol=2e-2, rtol=2e-2), (out_bf16, ref)

    print("KERNEL_OK")
</pallas_src>

<mosaic_0001>
module attributes {stable_mosaic.version = 11 : i64} {
  func.func @_discriminator_kernel(%arg0: memref<16x4xf32, #tpu.memory_space<vmem>>, %arg1: memref<2x64x192xf32, #tpu.memory_space<vmem>>, %arg2: memref<2x64x192xf32, #tpu.memory_space<vmem>>, %arg3: memref<7x64xf32, #tpu.memory_space<vmem>>, %arg4: memref<7x192xf32, #tpu.memory_space<vmem>>, %arg5: memref<2x1xf32, #tpu.memory_space<vmem>>, %arg6: memref<16x64xf32, #tpu.memory_space<vmem>>, %arg7: memref<16x64xf32, #tpu.memory_space<vmem>>) attributes {dimension_semantics = [], scalar_prefetch = 0 : i64, scratch_operands = 2 : i64, tpu.core_type = #tpu.core_type<tc>} {
    %c0 = arith.constant 0 : index
    %c0_0 = arith.constant 0 : index
    %0 = vector.load %arg3[%c0, %c0_0] : memref<7x64xf32, #tpu.memory_space<vmem>>, vector<4x64xf32>
    %c0_1 = arith.constant 0 : index
    %c0_2 = arith.constant 0 : index
    %1 = vector.load %arg4[%c0_1, %c0_2] : memref<7x192xf32, #tpu.memory_space<vmem>>, vector<1x64xf32>
    %c4 = arith.constant 4 : index
    %c0_3 = arith.constant 0 : index
    %2 = vector.load %arg3[%c4, %c0_3] : memref<7x64xf32, #tpu.memory_space<vmem>>, vector<1x64xf32>
    %c5 = arith.constant 5 : index
    %c0_4 = arith.constant 0 : index
    %3 = vector.load %arg3[%c5, %c0_4] : memref<7x64xf32, #tpu.memory_space<vmem>>, vector<2x16xf32>
    %c5_5 = arith.constant 5 : index
    %c0_6 = arith.constant 0 : index
    %4 = vector.load %arg4[%c5_5, %c0_6] : memref<7x192xf32, #tpu.memory_space<vmem>>, vector<1x1xf32>
    %c5_7 = arith.constant 5 : index
    %c1 = arith.constant 1 : index
    %5 = vector.load %arg4[%c5_7, %c1] : memref<7x192xf32, #tpu.memory_space<vmem>>, vector<1x1xf32>
    %c6 = arith.constant 6 : index
    %c0_8 = arith.constant 0 : index
    %6 = vector.load %arg4[%c6, %c0_8] : memref<7x192xf32, #tpu.memory_space<vmem>>, vector<1x192xf32>
    %cst = arith.constant 0.000000e+00 : f32
    %7 = vector.broadcast %cst : f32 to vector<1x192xf32>
    %8 = arith.cmpf one, %6, %7 : vector<1x192xf32>
    %c0_9 = arith.constant 0 : index
    %c0_10 = arith.constant 0 : index
    %9 = vector.load %arg0[%c0_9, %c0_10] : memref<16x4xf32, #tpu.memory_space<vmem>>, vector<16x4xf32>
    %cst_11 = arith.constant dense<0.000000e+00> : vector<16x64xf32>
    %10 = tpu.matmul %9, %0, %cst_11 {dimension_numbers = #tpu.dot_dimension_numbers<[1], [0], [0], [1], [0, 0, 1, 1], [], []>} : vector<16x4xf32>, vector<4x64xf32>, vector<16x64xf32> -> vector<16x64xf32>
    %11 = vector.broadcast %1 : vector<1x64xf32> to vector<16x64xf32>
    %12 = arith.addf %10, %11 : vector<16x64xf32>
    %cst_12 = arith.constant 0.000000e+00 : f32
    %13 = vector.broadcast %cst_12 : f32 to vector<16x64xf32>
    %14 = arith.maximumf %12, %13 : vector<16x64xf32>
    %c0_13 = arith.constant 0 : index
    %c0_14 = arith.constant 0 : index
    %c0_15 = arith.constant 0 : index
    %15 = vector.load %arg1[%c0_13, %c0_14, %c0_15] : memref<2x64x192xf32, #tpu.memory_space<vmem>>, vector<1x64x192xf32>
    %16 = vector.shape_cast %15 : vector<1x64x192xf32> to vector<64x192xf32>
    %cst_16 = arith.constant dense<0.000000e+00> : vector<16x192xf32>
    %17 = tpu.matmul %14, %16, %cst_16 {dimension_numbers = #tpu.dot_dimension_numbers<[1], [0], [0], [1], [0, 0, 1, 1], [], []>} : vector<16x64xf32>, vector<64x192xf32>, vector<16x192xf32> -> vector<16x192xf32>
    %c1_17 = arith.constant 1 : index
    %c0_18 = arith.constant 0 : index
    %18 = vector.load %arg4[%c1_17, %c0_18] : memref<7x192xf32, #tpu.memory_space<vmem>>, vector<1x192xf32>
    %19 = vector.broadcast %18 : vector<1x192xf32> to vector<16x192xf32>
    %20 = arith.addf %17, %19 : vector<16x192xf32>
    %c0_19 = arith.constant 0 : index
    %c0_20 = arith.constant 0 : index
    %c0_21 = arith.constant 0 : index
    %21 = vector.load %arg2[%c0_19, %c0_20, %c0_21] : memref<2x64x192xf32, #tpu.memory_space<vmem>>, vector<1x64x192xf32>
    %22 = vector.shape_cast %21 : vector<1x64x192xf32> to vector<64x192xf32>
    %c3 = arith.constant 3 : index
    %c0_22 = arith.constant 0 : index
    %23 = vector.load %arg4[%c3, %c0_22] : memref<7x192xf32, #tpu.memory_space<vmem>>, vector<1x64xf32>
    %cst_23 = arith.constant 0.000000e+00 : f32
    %24 = vector.broadcast %cst_23 : f32 to vector<2x64xf32>
    %25 = vector.extract_strided_slice %20 {offsets = [0, 0], sizes = [2, 192], strides = [1, 1]} : vector<16x192xf32> to vector<2x192xf32>
    %26 = vector.extract_strided_slice %20 {offsets = [14, 0], sizes = [2, 192], strides = [1, 1]} : vector<16x192xf32> to vector<2x192xf32>
    %27 = vector.shape_cast %8 : vector<1x192xi1> to vector<1x192xi1>
    %28 = vector.broadcast %27 : vector<1x192xi1> to vector<2x192xi1>
    %29 = arith.select %28, %25, %26 : vector<2x192xi1>, vector<2x192xf32>
    %cst_24 = arith.constant dense<0.000000e+00> : vector<2x192xf32>
    %30 = tpu.matmul %24, %22, %cst_24 {dimension_numbers = #tpu.dot_dimension_numbers<[1], [0], [0], [1], [0, 0, 1, 1], [], []>} : vector<2x64xf32>, vector<64x192xf32>, vector<2x192xf32> -> vector<2x192xf32>
    %31 = vector.extract_strided_slice %29 {offsets = [0, 0], sizes = [2, 64], strides = [1, 1]} : vector<2x192xf32> to vector<2x64xf32>
    %32 = vector.extract_strided_slice %30 {offsets = [0, 0], sizes = [2, 64], strides = [1, 1]} : vector<2x192xf32> to vector<2x64xf32>
    %33 = arith.addf %31, %32 : vector<2x64xf32>
    %34 = arith.negf %33 : vector<2x64xf32>
    %35 = math.exp %34 : vector<2x64xf32>
    %cst_25 = arith.constant 1.000000e+00 : f32
    %36 = vector.broadcast %cst_25 : f32 to vector<2x64xf32>
    %37 = arith.addf %36, %35 : vector<2x64xf32>
    %38 = arith.divf %36, %37 : vector<2x64xf32>
    %39 = vector.extract_strided_slice %29 {offsets = [0, 64], sizes = [2, 64], strides = [1, 1]} : vector<2x192xf32> to vector<2x64xf32>
    %40 = vector.extract_strided_slice %30 {offsets = [0, 64], sizes = [2, 64], strides = [1, 1]} : vector<2x192xf32> to vector<2x64xf32>
    %41 = arith.addf %39, %40 : vector<2x64xf32>
    %42 = arith.negf %41 : vector<2x64xf32>
    %43 = math.exp %42 : vector<2x64xf32>
    %cst_26 = arith.constant 1.000000e+00 : f32
    %44 = vector.broadcast %cst_26 : f32 to vector<2x64xf32>
    %45 = arith.addf %44, %43 : vector<2x64xf32>
    %46 = arith.divf %44, %45 : vector<2x64xf32>
    %47 = vector.extract_strided_slice %29 {offsets = [0, 128], sizes = [2, 64], strides = [1, 1]} : vector<2x192xf32> to vector<2x64xf32>
    %48 = vector.extract_strided_slice %30 {offsets = [0, 128], sizes = [2, 64], strides = [1, 1]} : vector<2x192xf32> to vector<2x64xf32>
    %49 = vector.broadcast %23 : vector<1x64xf32> to vector<2x64xf32>
    %50 = arith.addf %48, %49 : vector<2x64xf32>
    %51 = arith.mulf %38, %50 : vector<2x64xf32>
    %52 = arith.addf %47, %51 : vector<2x64xf32>
    %53 = math.tanh %52 : vector<2x64xf32>
    %cst_27 = arith.constant 1.000000e+00 : f32
    %54 = vector.broadcast %cst_27 : f32 to vector<2x64xf32>
    %55 = arith.subf %54, %46 : vector<2x64xf32>
    %56 = arith.mulf %55, %53 : vector<2x64xf32>
    %57 = arith.mulf %46, %24 : vector<2x64xf32>
    %58 = arith.addf %56, %57 : vector<2x64xf32>
    %59 = vector.extract_strided_slice %58 {offsets = [0, 0], sizes = [2, 32], strides = [1, 1]} : vector<2x64xf32> to vector<2x32xf32>
    %c0_28 = arith.constant 0 : index
    %c0_29 = arith.constant 0 : index
    %60 = vector.load %arg6[%c0_28, %c0_29] : memref<16x64xf32, #tpu.memory_space<vmem>>, vector<2x32xf32>
    tpu.vector_store %arg6[%c0_28, %c0_29], %59 {strides = array<i32>} : memref<16x64xf32, #tpu.memory_space<vmem>>, vector<2x32xf32>,
    %61 = vector.extract_strided_slice %58 {offsets = [0, 32], sizes = [2, 32], strides = [1, 1]} : vector<2x64xf32> to vector<2x32xf32>
    %c14 = arith.constant 14 : index
    %c32 = arith.constant 32 : index
    %62 = vector.load %arg6[%c14, %c32] : memref<16x64xf32, #tpu.memory_space<vmem>>, vector<2x32xf32>
    tpu.vector_store %arg6[%c14, %c32], %61 {strides = array<i32>} : memref<16x64xf32, #tpu.memory_space<vmem>>, vector<2x32xf32>,
    %63 = vector.extract_strided_slice %20 {offsets = [2, 0], sizes = [2, 192], strides = [1, 1]} : vector<16x192xf32> to vector<2x192xf32>
    %64 = vector.extract_strided_slice %20 {offsets = [12, 0], sizes = [2, 192], strides = [1, 1]} : vector<16x192xf32> to vector<2x192xf32>
    %65 = vector.shape_cast %8 : vector<1x192xi1> to vector<1x192xi1>
    %66 = vector.broadcast %65 : vector<1x192xi1> to vector<2x192xi1>
    %67 = arith.select %66, %63, %64 : vector<2x192xi1>, vector<2x192xf32>
    %cst_30 = arith.constant dense<0.000000e+00> : vector<2x192xf32>
    %68 = tpu.matmul %58, %22, %cst_30 {dimension_numbers = #tpu.dot_dimension_numbers<[1], [0], [0], [1], [0, 0, 1, 1], [], []>} : vector<2x64xf32>, vector<64x192xf32>, vector<2x192xf32> -> vector<2x192xf32>
    %69 = vector.extract_strided_slice %67 {offsets = [0, 0], sizes = [2, 64], strides = [1, 1]} : vector<2x192xf32> to vector<2x64xf32>
    %70 = vector.extract_strided_slice %68 {offsets = [0, 0], sizes = [2, 64], strides = [1, 1]} : vector<2x192xf32> to vector<2x64xf32>
    %71 = arith.addf %69, %70 : vector<2x64xf32>
    %72 = arith.negf %71 : vector<2x64xf32>
    %73 = math.exp %72 : vector<2x64xf32>
    %cst_31 = arith.constant 1.000000e+00 : f32
    %74 = vector.broadcast %cst_31 : f32 to vector<2x64xf32>
    %75 = arith.addf %74, %73 : vector<2x64xf32>
    %76 = arith.divf %74, %75 : vector<2x64xf32>
    %77 = vector.extract_strided_slice %67 {offsets = [0, 64], sizes = [2, 64], strides = [1, 1]} : vector<2x192xf32> to vector<2x64xf32>
    %78 = vector.extract_strided_slice %68 {offsets = [0, 64], sizes = [2, 64], strides = [1, 1]} : vector<2x192xf32> to vector<2x64xf32>
    %79 = arith.addf %77, %78 : vector<2x64xf32>
    %80 = arith.negf %79 : vector<2x64xf32>
    %81 = math.exp %80 : vector<2x64xf32>
    %cst_32 = arith.constant 1.000000e+00 : f32
    %82 = vector.broadcast %cst_32 : f32 to vector<2x64xf32>
    %83 = arith.addf %82, %81 : vector<2x64xf32>
    %84 = arith.divf %82, %83 : vector<2x64xf32>
    %85 = vector.extract_strided_slice %67 {offsets = [0, 128], sizes = [2, 64], strides = [1, 1]} : vector<2x192xf32> to vector<2x64xf32>
    %86 = vector.extract_strided_slice %68 {offsets = [0, 128], sizes = [2, 64], strides = [1, 1]} : vector<2x192xf32> to vector<2x64xf32>
    %87 = vector.broadcast %23 : vector<1x64xf32> to vector<2x64xf32>
    %88 = arith.addf %86, %87 : vector<2x64xf32>
    %89 = arith.mulf %76, %88 : vector<2x64xf32>
    %90 = arith.addf %85, %89 : vector<2x64xf32>
    %91 = math.tanh %90 : vector<2x64xf32>
    %cst_33 = arith.constant 1.000000e+00 : f32
    %92 = vector.broadcast %cst_33 : f32 to vector<2x64xf32>
    %93 = arith.subf %92, %84 : vector<2x64xf32>
    %94 = arith.mulf %93, %91 : vector<2x64xf32>
    %95 = arith.mulf %84, %58 : vector<2x64xf32>
    %96 = arith.addf %94, %95 : vector<2x64xf32>
    %97 = vector.extract_strided_slice %96 {offsets = [0, 0], sizes = [2, 32], strides = [1, 1]} : vector<2x64xf32> to vector<2x32xf32>
    %c2 = arith.constant 2 : index
    %c0_34 = arith.constant 0 : index
    %98 = vector.load %arg6[%c2, %c0_34] : memref<16x64xf32, #tpu.memory_space<vmem>>, vector<2x32xf32>
    tpu.vector_store %arg6[%c2, %c0_34], %97 {strides = array<i32>} : memref<16x64xf32, #tpu.memory_space<vmem>>, vector<2x32xf32>,
    %99 = vector.extract_strided_slice %96 {offsets = [0, 32], sizes = [2, 32], strides = [1, 1]} : vector<2x64xf32> to vector<2x32xf32>
    %c12 = arith.constant 12 : index
    %c32_35 = arith.constant 32 : index
    %100 = vector.load %arg6[%c12, %c32_35] : memref<16x64xf32, #tpu.memory_space<vmem>>, vector<2x32xf32>
    tpu.vector_store %arg6[%c12, %c32_35], %99 {strides = array<i32>} : memref<16x64xf32, #tpu.memory_space<vmem>>, vector<2x32xf32>,
    %101 = vector.extract_strided_slice %20 {offsets = [4, 0], sizes = [2, 192], strides = [1, 1]} : vector<16x192xf32> to vector<2x192xf32>
    %102 = vector.extract_strided_slice %20 {offsets = [10, 0], sizes = [2, 192], strides = [1, 1]} : vector<16x192xf32> to vector<2x192xf32>
    %103 = vector.shape_cast %8 : vector<1x192xi1> to vector<1x192xi1>
    %104 = vector.broadcast %103 : vector<1x192xi1> to vector<2x192xi1>
    %105 = arith.select %104, %101, %102 : vector<2x192xi1>, vector<2x192xf32>
    %cst_36 = arith.constant dense<0.000000e+00> : vector<2x192xf32>
    %106 = tpu.matmul %96, %22, %cst_36 {dimension_numbers = #tpu.dot_dimension_numbers<[1], [0], [0], [1], [0, 0, 1, 1], [], []>} : vector<2x64xf32>, vector<64x192xf32>, vector<2x192xf32> -> vector<2x192xf32>
    %107 = vector.extract_strided_slice %105 {offsets = [0, 0], sizes = [2, 64], strides = [1, 1]} : vector<2x192xf32> to vector<2x64xf32>
    %108 = vector.extract_strided_slice %106 {offsets = [0, 0], sizes = [2, 64], strides = [1, 1]} : vector<2x192xf32> to vector<2x64xf32>
    %109 = arith.addf %107, %108 : vector<2x64xf32>
    %110 = arith.negf %109 : vector<2x64xf32>
    %111 = math.exp %110 : vector<2x64xf32>
    %cst_37 = arith.constant 1.000000e+00 : f32
    %112 = vector.broadcast %cst_37 : f32 to vector<2x64xf32>
    %113 = arith.addf %112, %111 : vector<2x64xf32>
    %114 = arith.divf %112, %113 : vector<2x64xf32>
    %115 = vector.extract_strided_slice %105 {offsets = [0, 64], sizes = [2, 64], strides = [1, 1]} : vector<2x192xf32> to vector<2x64xf32>
    %116 = vector.extract_strided_slice %106 {offsets = [0, 64], sizes = [2, 64], strides = [1, 1]} : vector<2x192xf32> to vector<2x64xf32>
    %117 = arith.addf %115, %116 : vector<2x64xf32>
    %118 = arith.negf %117 : vector<2x64xf32>
    %119 = math.exp %118 : vector<2x64xf32>
    %cst_38 = arith.constant 1.000000e+00 : f32
    %120 = vector.broadcast %cst_38 : f32 to vector<2x64xf32>
    %121 = arith.addf %120, %119 : vector<2x64xf32>
    %122 = arith.divf %120, %121 : vector<2x64xf32>
    %123 = vector.extract_strided_slice %105 {offsets = [0, 128], sizes = [2, 64], strides = [1, 1]} : vector<2x192xf32> to vector<2x64xf32>
    %124 = vector.extract_strided_slice %106 {offsets = [0, 128], sizes = [2, 64], strides = [1, 1]} : vector<2x192xf32> to vector<2x64xf32>
    %125 = vector.broadcast %23 : vector<1x64xf32> to vector<2x64xf32>
    %126 = arith.addf %124, %125 : vector<2x64xf32>
    %127 = arith.mulf %114, %126 : vector<2x64xf32>
    %128 = arith.addf %123, %127 : vector<2x64xf32>
    %129 = math.tanh %128 : vector<2x64xf32>
    %cst_39 = arith.constant 1.000000e+00 : f32
    %130 = vector.broadcast %cst_39 : f32 to vector<2x64xf32>
    %131 = arith.subf %130, %122 : vector<2x64xf32>
    %132 = arith.mulf %131, %129 : vector<2x64xf32>
    %133 = arith.mulf %122, %96 : vector<2x64xf32>
    %134 = arith.addf %132, %133 : vector<2x64xf32>
    %135 = vector.extract_strided_slice %134 {offsets = [0, 0], sizes = [2, 32], strides = [1, 1]} : vector<2x64xf32> to vector<2x32xf32>
    %c4_40 = arith.constant 4 : index
    %c0_41 = arith.constant 0 : index
    %136 = vector.load %arg6[%c4_40, %c0_41] : memref<16x64xf32, #tpu.memory_space<vmem>>, vector<2x32xf32>
    tpu.vector_store %arg6[%c4_40, %c0_41], %135 {strides = array<i32>} : memref<16x64xf32, #tpu.memory_space<vmem>>, vector<2x32xf32>,
    %137 = vector.extract_strided_slice %134 {offsets = [0, 32], sizes = [2, 32], strides = [1, 1]} : vector<2x64xf32> to vector<2x32xf32>
    %c10 = arith.constant 10 : index
    %c32_42 = arith.constant 32 : index
    %138 = vector.load %arg6[%c10, %c32_42] : memref<16x64xf32, #tpu.memory_space<vmem>>, vector<2x32xf32>
    tpu.vector_store %arg6[%c10, %c32_42], %137 {strides = array<i32>} : memref<16x64xf32, #tpu.memory_space<vmem>>, vector<2x32xf32>,
    %139 = vector.extract_strided_slice %20 {offsets = [6, 0], sizes = [2, 192], strides = [1, 1]} : vector<16x192xf32> to vector<2x192xf32>
    %140 = vector.extract_strided_slice %20 {offsets = [8, 0], sizes = [2, 192], strides = [1, 1]} : vector<16x192xf32> to vector<2x192xf32>
    %141 = vector.shape_cast %8 : vector<1x192xi1> to vector<1x192xi1>
    %142 = vector.broadcast %141 : vector<1x192xi1> to vector<2x192xi1>
    %143 = arith.select %142, %139, %140 : vector<2x192xi1>, vector<2x192xf32>
    %cst_43 = arith.constant dense<0.000000e+00> : vector<2x192xf32>
    %144 = tpu.matmul %134, %22, %cst_43 {dimension_numbers = #tpu.dot_dimension_numbers<[1], [0], [0], [1], [0, 0, 1, 1], [], []>} : vector<2x64xf32>, vector<64x192xf32>, vector<2x192xf32> -> vector<2x192xf32>
    %145 = vector.extract_strided_slice %143 {offsets = [0, 0], sizes = [2, 64], strides = [1, 1]} : vector<2x192xf32> to vector<2x64xf32>
    %146 = vector.extract_strided_slice %144 {offsets = [0, 0], sizes = [2, 64], strides = [1, 1]} : vector<2x192xf32> to vector<2x64xf32>
    %147 = arith.addf %145, %146 : vector<2x64xf32>
    %148 = arith.negf %147 : vector<2x64xf32>
    %149 = math.exp %148 : vector<2x64xf32>
    %cst_44 = arith.constant 1.000000e+00 : f32
    %150 = vector.broadcast %cst_44 : f32 to vector<2x64xf32>
    %151 = arith.addf %150, %149 : vector<2x64xf32>
    %152 = arith.divf %150, %151 : vector<2x64xf32>
    %153 = vector.extract_strided_slice %143 {offsets = [0, 64], sizes = [2, 64], strides = [1, 1]} : vector<2x192xf32> to vector<2x64xf32>
    %154 = vector.extract_strided_slice %144 {offsets = [0, 64], sizes = [2, 64], strides = [1, 1]} : vector<2x192xf32> to vector<2x64xf32>
    %155 = arith.addf %153, %154 : vector<2x64xf32>
    %156 = arith.negf %155 : vector<2x64xf32>
    %157 = math.exp %156 : vector<2x64xf32>
    %cst_45 = arith.constant 1.000000e+00 : f32
    %158 = vector.broadcast %cst_45 : f32 to vector<2x64xf32>
    %159 = arith.addf %158, %157 : vector<2x64xf32>
    %160 = arith.divf %158, %159 : vector<2x64xf32>
    %161 = vector.extract_strided_slice %143 {offsets = [0, 128], sizes = [2, 64], strides = [1, 1]} : vector<2x192xf32> to vector<2x64xf32>
    %162 = vector.extract_strided_slice %144 {offsets = [0, 128], sizes = [2, 64], strides = [1, 1]} : vector<2x192xf32> to vector<2x64xf32>
    %163 = vector.broadcast %23 : vector<1x64xf32> to vector<2x64xf32>
    %164 = arith.addf %162, %163 : vector<2x64xf32>
    %165 = arith.mulf %152, %164 : vector<2x64xf32>
    %166 = arith.addf %161, %165 : vector<2x64xf32>
    %167 = math.tanh %166 : vector<2x64xf32>
    %cst_46 = arith.constant 1.000000e+00 : f32
    %168 = vector.broadcast %cst_46 : f32 to vector<2x64xf32>
    %169 = arith.subf %168, %160 : vector<2x64xf32>
    %170 = arith.mulf %169, %167 : vector<2x64xf32>
    %171 = arith.mulf %160, %134 : vector<2x64xf32>
    %172 = arith.addf %170, %171 : vector<2x64xf32>
    %173 = vector.extract_strided_slice %172 {offsets = [0, 0], sizes = [2, 32], strides = [1, 1]} : vector<2x64xf32> to vector<2x32xf32>
    %c6_47 = arith.constant 6 : index
    %c0_48 = arith.constant 0 : index
    %174 = vector.load %arg6[%c6_47, %c0_48] : memref<16x64xf32, #tpu.memory_space<vmem>>, vector<2x32xf32>
    tpu.vector_store %arg6[%c6_47, %c0_48], %173 {strides = array<i32>} : memref<16x64xf32, #tpu.memory_space<vmem>>, vector<2x32xf32>,
    %175 = vector.extract_strided_slice %172 {offsets = [0, 32], sizes = [2, 32], strides = [1, 1]} : vector<2x64xf32> to vector<2x32xf32>
    %c8 = arith.constant 8 : index
    %c32_49 = arith.constant 32 : index
    %176 = vector.load %arg6[%c8, %c32_49] : memref<16x64xf32, #tpu.memory_space<vmem>>, vector<2x32xf32>
    tpu.vector_store %arg6[%c8, %c32_49], %175 {strides = array<i32>} : memref<16x64xf32, #tpu.memory_space<vmem>>, vector<2x32xf32>,
    %177 = vector.extract_strided_slice %20 {offsets = [8, 0], sizes = [2, 192], strides = [1, 1]} : vector<16x192xf32> to vector<2x192xf32>
    %178 = vector.extract_strided_slice %20 {offsets = [6, 0], sizes = [2, 192], strides = [1, 1]} : vector<16x192xf32> to vector<2x192xf32>
    %179 = vector.shape_cast %8 : vector<1x192xi1> to vector<1x192xi1>
    %180 = vector.broadcast %179 : vector<1x192xi1> to vector<2x192xi1>
    %181 = arith.select %180, %177, %178 : vector<2x192xi1>, vector<2x192xf32>
    %cst_50 = arith.constant dense<0.000000e+00> : vector<2x192xf32>
    %182 = tpu.matmul %172, %22, %cst_50 {dimension_numbers = #tpu.dot_dimension_numbers<[1], [0], [0], [1], [0, 0, 1, 1], [], []>} : vector<2x64xf32>, vector<64x192xf32>, vector<2x192xf32> -> vector<2x192xf32>
    %183 = vector.extract_strided_slice %181 {offsets = [0, 0], sizes = [2, 64], strides = [1, 1]} : vector<2x192xf32> to vector<2x64xf32>
    %184 = vector.extract_strided_slice %182 {offsets = [0, 0], sizes = [2, 64], strides = [1, 1]} : vector<2x192xf32> to vector<2x64xf32>
    %185 = arith.addf %183, %184 : vector<2x64xf32>
    %186 = arith.negf %185 : vector<2x64xf32>
    %187 = math.exp %186 : vector<2x64xf32>
    %cst_51 = arith.constant 1.000000e+00 : f32
    %188 = vector.broadcast %cst_51 : f32 to vector<2x64xf32>
    %189 = arith.addf %188, %187 : vector<2x64xf32>
    %190 = arith.divf %188, %189 : vector<2x64xf32>
    %191 = vector.extract_strided_slice %181 {offsets = [0, 64], sizes = [2, 64], strides = [1, 1]} : vector<2x192xf32> to vector<2x64xf32>
    %192 = vector.extract_strided_slice %182 {offsets = [0, 64], sizes = [2, 64], strides = [1, 1]} : vector<2x192xf32> to vector<2x64xf32>
    %193 = arith.addf %191, %192 : vector<2x64xf32>
    %194 = arith.negf %193 : vector<2x64xf32>
    %195 = math.exp %194 : vector<2x64xf32>
    %cst_52 = arith.constant 1.000000e+00 : f32
    %196 = vector.broadcast %cst_52 : f32 to vector<2x64xf32>
    %197 = arith.addf %196, %195 : vector<2x64xf32>
    %198 = arith.divf %196, %197 : vector<2x64xf32>
    %199 = vector.extract_strided_slice %181 {offsets = [0, 128], sizes = [2, 64], strides = [1, 1]} : vector<2x192xf32> to vector<2x64xf32>
    %200 = vector.extract_strided_slice %182 {offsets = [0, 128], sizes = [2, 64], strides = [1, 1]} : vector<2x192xf32> to vector<2x64xf32>
    %201 = vector.broadcast %23 : vector<1x64xf32> to vector<2x64xf32>
    %202 = arith.addf %200, %201 : vector<2x64xf32>
    %203 = arith.mulf %190, %202 : vector<2x64xf32>
    %204 = arith.addf %199, %203 : vector<2x64xf32>
    %205 = math.tanh %204 : vector<2x64xf32>
    %cst_53 = arith.constant 1.000000e+00 : f32
    %206 = vector.broadcast %cst_53 : f32 to vector<2x64xf32>
    %207 = arith.subf %206, %198 : vector<2x64xf32>
    %208 = arith.mulf %207, %205 : vector<2x64xf32>
    %209 = arith.mulf %198, %172 : vector<2x64xf32>
    %210 = arith.addf %208, %209 : vector<2x64xf32>
    %211 = vector.extract_strided_slice %210 {offsets = [0, 0], sizes = [2, 32], strides = [1, 1]} : vector<2x64xf32> to vector<2x32xf32>
    %c8_54 = arith.constant 8 : index
    %c0_55 = arith.constant 0 : index
    %212 = vector.load %arg6[%c8_54, %c0_55] : memref<16x64xf32, #tpu.memory_space<vmem>>, vector<2x32xf32>
    tpu.vector_store %arg6[%c8_54, %c0_55], %211 {strides = array<i32>} : memref<16x64xf32, #tpu.memory_space<vmem>>, vector<2x32xf32>,
    %213 = vector.extract_strided_slice %210 {offsets = [0, 32], sizes = [2, 32], strides = [1, 1]} : vector<2x64xf32> to vector<2x32xf32>
    %c6_56 = arith.constant 6 : index
    %c32_57 = arith.constant 32 : index
    %214 = vector.load %arg6[%c6_56, %c32_57] : memref<16x64xf32, #tpu.memory_space<vmem>>, vector<2x32xf32>
    tpu.vector_store %arg6[%c6_56, %c32_57], %213 {strides = array<i32>} : memref<16x64xf32, #tpu.memory_space<vmem>>, vector<2x32xf32>,
    %215 = vector.extract_strided_slice %20 {offsets = [10, 0], sizes = [2, 192], strides = [1, 1]} : vector<16x192xf32> to vector<2x192xf32>
    %216 = vector.extract_strided_slice %20 {offsets = [4, 0], sizes = [2, 192], strides = [1, 1]} : vector<16x192xf32> to vector<2x192xf32>
    %217 = vector.shape_cast %8 : vector<1x192xi1> to vector<1x192xi1>
    %218 = vector.broadcast %217 : vector<1x192xi1> to vector<2x192xi1>
    %219 = arith.select %218, %215, %216 : vector<2x192xi1>, vector<2x192xf32>
    %cst_58 = arith.constant dense<0.000000e+00> : vector<2x192xf32>
    %220 = tpu.matmul %210, %22, %cst_58 {dimension_numbers = #tpu.dot_dimension_numbers<[1], [0], [0], [1], [0, 0, 1, 1], [], []>} : vector<2x64xf32>, vector<64x192xf32>, vector<2x192xf32> -> vector<2x192xf32>
    %221 = vector.extract_strided_slice %219 {offsets = [0, 0], sizes = [2, 64], strides = [1, 1]} : vector<2x192xf32> to vector<2x64xf32>
    %222 = vector.extract_strided_slice %220 {offsets = [0, 0], sizes = [2, 64], strides = [1, 1]} : vector<2x192xf32> to vector<2x64xf32>
    %223 = arith.addf %221, %222 : vector<2x64xf32>
    %224 = arith.negf %223 : vector<2x64xf32>
    %225 = math.exp %224 : vector<2x64xf32>
    %cst_59 = arith.constant 1.000000e+00 : f32
    %226 = vector.broadcast %cst_59 : f32 to vector<2x64xf32>
    %227 = arith.addf %226, %225 : vector<2x64xf32>
    %228 = arith.divf %226, %227 : vector<2x64xf32>
    %229 = vector.extract_strided_slice %219 {offsets = [0, 64], sizes = [2, 64], strides = [1, 1]} : vector<2x192xf32> to vector<2x64xf32>
    %230 = vector.extract_strided_slice %220 {offsets = [0, 64], sizes = [2, 64], strides = [1, 1]} : vector<2x192xf32> to vector<2x64xf32>
    %231 = arith.addf %229, %230 : vector<2x64xf32>
    %232 = arith.negf %231 : vector<2x64xf32>
    %233 = math.exp %232 : vector<2x64xf32>
    %cst_60 = arith.constant 1.000000e+00 : f32
    %234 = vector.broadcast %cst_60 : f32 to vector<2x64xf32>
    %235 = arith.addf %234, %233 : vector<2x64xf32>
    %236 = arith.divf %234, %235 : vector<2x64xf32>
    %237 = vector.extract_strided_slice %219 {offsets = [0, 128], sizes = [2, 64], strides = [1, 1]} : vector<2x192xf32> to vector<2x64xf32>
    %238 = vector.extract_strided_slice %220 {offsets = [0, 128], sizes = [2, 64], strides = [1, 1]} : vector<2x192xf32> to vector<2x64xf32>
    %239 = vector.broadcast %23 : vector<1x64xf32> to vector<2x64xf32>
    %240 = arith.addf %238, %239 : vector<2x64xf32>
    %241 = arith.mulf %228, %240 : vector<2x64xf32>
    %242 = arith.addf %237, %241 : vector<2x64xf32>
    %243 = math.tanh %242 : vector<2x64xf32>
    %cst_61 = arith.constant 1.000000e+00 : f32
    %244 = vector.broadcast %cst_61 : f32 to vector<2x64xf32>
    %245 = arith.subf %244, %236 : vector<2x64xf32>
    %246 = arith.mulf %245, %243 : vector<2x64xf32>
    %247 = arith.mulf %236, %210 : vector<2x64xf32>
    %248 = arith.addf %246, %247 : vector<2x64xf32>
    %249 = vector.extract_strided_slice %248 {offsets = [0, 0], sizes = [2, 32], strides = [1, 1]} : vector<2x64xf32> to vector<2x32xf32>
    %c10_62 = arith.constant 10 : index
    %c0_63 = arith.constant 0 : index
    %250 = vector.load %arg6[%c10_62, %c0_63] : memref<16x64xf32, #tpu.memory_space<vmem>>, vector<2x32xf32>
    tpu.vector_store %arg6[%c10_62, %c0_63], %249 {strides = array<i32>} : memref<16x64xf32, #tpu.memory_space<vmem>>, vector<2x32xf32>,
    %251 = vector.extract_strided_slice %248 {offsets = [0, 32], sizes = [2, 32], strides = [1, 1]} : vector<2x64xf32> to vector<2x32xf32>
    %c4_64 = arith.constant 4 : index
    %c32_65 = arith.constant 32 : index
    %252 = vector.load %arg6[%c4_64, %c32_65] : memref<16x64xf32, #tpu.memory_space<vmem>>, vector<2x32xf32>
    tpu.vector_store %arg6[%c4_64, %c32_65], %251 {strides = array<i32>} : memref<16x64xf32, #tpu.memory_space<vmem>>, vector<2x32xf32>,
    %253 = vector.extract_strided_slice %20 {offsets = [12, 0], sizes = [2, 192], strides = [1, 1]} : vector<16x192xf32> to vector<2x192xf32>
    %254 = vector.extract_strided_slice %20 {offsets = [2, 0], sizes = [2, 192], strides = [1, 1]} : vector<16x192xf32> to vector<2x192xf32>
    %255 = vector.shape_cast %8 : vector<1x192xi1> to vector<1x192xi1>
    %256 = vector.broadcast %255 : vector<1x192xi1> to vector<2x192xi1>
    %257 = arith.select %256, %253, %254 : vector<2x192xi1>, vector<2x192xf32>
    %cst_66 = arith.constant dense<0.000000e+00> : vector<2x192xf32>
    %258 = tpu.matmul %248, %22, %cst_66 {dimension_numbers = #tpu.dot_dimension_numbers<[1], [0], [0], [1], [0, 0, 1, 1], [], []>} : vector<2x64xf32>, vector<64x192xf32>, vector<2x192xf32> -> vector<2x192xf32>
    %259 = vector.extract_strided_slice %257 {offsets = [0, 0], sizes = [2, 64], strides = [1, 1]} : vector<2x192xf32> to vector<2x64xf32>
    %260 = vector.extract_strided_slice %258 {offsets = [0, 0], sizes = [2, 64], strides = [1, 1]} : vector<2x192xf32> to vector<2x64xf32>
    %261 = arith.addf %259, %260 : vector<2x64xf32>
    %262 = arith.negf %261 : vector<2x64xf32>
    %263 = math.exp %262 : vector<2x64xf32>
    %cst_67 = arith.constant 1.000000e+00 : f32
    %264 = vector.broadcast %cst_67 : f32 to vector<2x64xf32>
    %265 = arith.addf %264, %263 : vector<2x64xf32>
    %266 = arith.divf %264, %265 : vector<2x64xf32>
    %267 = vector.extract_strided_slice %257 {offsets = [0, 64], sizes = [2, 64], strides = [1, 1]} : vector<2x192xf32> to vector<2x64xf32>
    %268 = vector.extract_strided_slice %258 {offsets = [0, 64], sizes = [2, 64], strides = [1, 1]} : vector<2x192xf32> to vector<2x64xf32>
    %269 = arith.addf %267, %268 : vector<2x64xf32>
    %270 = arith.negf %269 : vector<2x64xf32>
    %271 = math.exp %270 : vector<2x64xf32>
    %cst_68 = arith.constant 1.000000e+00 : f32
    %272 = vector.broadcast %cst_68 : f32 to vector<2x64xf32>
    %273 = arith.addf %272, %271 : vector<2x64xf32>
    %274 = arith.divf %272, %273 : vector<2x64xf32>
    %275 = vector.extract_strided_slice %257 {offsets = [0, 128], sizes = [2, 64], strides = [1, 1]} : vector<2x192xf32> to vector<2x64xf32>
    %276 = vector.extract_strided_slice %258 {offsets = [0, 128], sizes = [2, 64], strides = [1, 1]} : vector<2x192xf32> to vector<2x64xf32>
    %277 = vector.broadcast %23 : vector<1x64xf32> to vector<2x64xf32>
    %278 = arith.addf %276, %277 : vector<2x64xf32>
    %279 = arith.mulf %266, %278 : vector<2x64xf32>
    %280 = arith.addf %275, %279 : vector<2x64xf32>
    %281 = math.tanh %280 : vector<2x64xf32>
    %cst_69 = arith.constant 1.000000e+00 : f32
    %282 = vector.broadcast %cst_69 : f32 to vector<2x64xf32>
    %283 = arith.subf %282, %274 : vector<2x64xf32>
    %284 = arith.mulf %283, %281 : vector<2x64xf32>
    %285 = arith.mulf %274, %248 : vector<2x64xf32>
    %286 = arith.addf %284, %285 : vector<2x64xf32>
    %287 = vector.extract_strided_slice %286 {offsets = [0, 0], sizes = [2, 32], strides = [1, 1]} : vector<2x64xf32> to vector<2x32xf32>
    %c12_70 = arith.constant 12 : index
    %c0_71 = arith.constant 0 : index
    %288 = vector.load %arg6[%c12_70, %c0_71] : memref<16x64xf32, #tpu.memory_space<vmem>>, vector<2x32xf32>
    tpu.vector_store %arg6[%c12_70, %c0_71], %287 {strides = array<i32>} : memref<16x64xf32, #tpu.memory_space<vmem>>, vector<2x32xf32>,
    %289 = vector.extract_strided_slice %286 {offsets = [0, 32], sizes = [2, 32], strides = [1, 1]} : vector<2x64xf32> to vector<2x32xf32>
    %c2_72 = arith.constant 2 : index
    %c32_73 = arith.constant 32 : index
    %290 = vector.load %arg6[%c2_72, %c32_73] : memref<16x64xf32, #tpu.memory_space<vmem>>, vector<2x32xf32>
    tpu.vector_store %arg6[%c2_72, %c32_73], %289 {strides = array<i32>} : memref<16x64xf32, #tpu.memory_space<vmem>>, vector<2x32xf32>,
    %291 = vector.extract_strided_slice %20 {offsets = [14, 0], sizes = [2, 192], strides = [1, 1]} : vector<16x192xf32> to vector<2x192xf32>
    %292 = vector.extract_strided_slice %20 {offsets = [0, 0], sizes = [2, 192], strides = [1, 1]} : vector<16x192xf32> to vector<2x192xf32>
    %293 = vector.shape_cast %8 : vector<1x192xi1> to vector<1x192xi1>
    %294 = vector.broadcast %293 : vector<1x192xi1> to vector<2x192xi1>
    %295 = arith.select %294, %291, %292 : vector<2x192xi1>, vector<2x192xf32>
    %cst_74 = arith.constant dense<0.000000e+00> : vector<2x192xf32>
    %296 = tpu.matmul %286, %22, %cst_74 {dimension_numbers = #tpu.dot_dimension_numbers<[1], [0], [0], [1], [0, 0, 1, 1], [], []>} : vector<2x64xf32>, vector<64x192xf32>, vector<2x192xf32> -> vector<2x192xf32>
    %297 = vector.extract_strided_slice %295 {offsets = [0, 0], sizes = [2, 64], strides = [1, 1]} : vector<2x192xf32> to vector<2x64xf32>
    %298 = vector.extract_strided_slice %296 {offsets = [0, 0], sizes = [2, 64], strides = [1, 1]} : vector<2x192xf32> to vector<2x64xf32>
    %299 = arith.addf %297, %298 : vector<2x64xf32>
    %300 = arith.negf %299 : vector<2x64xf32>
    %301 = math.exp %300 : vector<2x64xf32>
    %cst_75 = arith.constant 1.000000e+00 : f32
    %302 = vector.broadcast %cst_75 : f32 to vector<2x64xf32>
    %303 = arith.addf %302, %301 : vector<2x64xf32>
    %304 = arith.divf %302, %303 : vector<2x64xf32>
    %305 = vector.extract_strided_slice %295 {offsets = [0, 64], sizes = [2, 64], strides = [1, 1]} : vector<2x192xf32> to vector<2x64xf32>
    %306 = vector.extract_strided_slice %296 {offsets = [0, 64], sizes = [2, 64], strides = [1, 1]} : vector<2x192xf32> to vector<2x64xf32>
    %307 = arith.addf %305, %306 : vector<2x64xf32>
    %308 = arith.negf %307 : vector<2x64xf32>
    %309 = math.exp %308 : vector<2x64xf32>
    %cst_76 = arith.constant 1.000000e+00 : f32
    %310 = vector.broadcast %cst_76 : f32 to vector<2x64xf32>
    %311 = arith.addf %310, %309 : vector<2x64xf32>
    %312 = arith.divf %310, %311 : vector<2x64xf32>
    %313 = vector.extract_strided_slice %295 {offsets = [0, 128], sizes = [2, 64], strides = [1, 1]} : vector<2x192xf32> to vector<2x64xf32>
    %314 = vector.extract_strided_slice %296 {offsets = [0, 128], sizes = [2, 64], strides = [1, 1]} : vector<2x192xf32> to vector<2x64xf32>
    %315 = vector.broadcast %23 : vector<1x64xf32> to vector<2x64xf32>
    %316 = arith.addf %314, %315 : vector<2x64xf32>
    %317 = arith.mulf %304, %316 : vector<2x64xf32>
    %318 = arith.addf %313, %317 : vector<2x64xf32>
    %319 = math.tanh %318 : vector<2x64xf32>
    %cst_77 = arith.constant 1.000000e+00 : f32
    %320 = vector.broadcast %cst_77 : f32 to vector<2x64xf32>
    %321 = arith.subf %320, %312 : vector<2x64xf32>
    %322 = arith.mulf %321, %319 : vector<2x64xf32>
    %323 = arith.mulf %312, %286 : vector<2x64xf32>
    %324 = arith.addf %322, %323 : vector<2x64xf32>
    %325 = vector.extract_strided_slice %324 {offsets = [0, 0], sizes = [2, 32], strides = [1, 1]} : vector<2x64xf32> to vector<2x32xf32>
    %c14_78 = arith.constant 14 : index
    %c0_79 = arith.constant 0 : index
    %326 = vector.load %arg6[%c14_78, %c0_79] : memref<16x64xf32, #tpu.memory_space<vmem>>, vector<2x32xf32>
    tpu.vector_store %arg6[%c14_78, %c0_79], %325 {strides = array<i32>} : memref<16x64xf32, #tpu.memory_space<vmem>>, vector<2x32xf32>,
    %327 = vector.extract_strided_slice %324 {offsets = [0, 32], sizes = [2, 32], strides = [1, 1]} : vector<2x64xf32> to vector<2x32xf32>
    %c0_80 = arith.constant 0 : index
    %c32_81 = arith.constant 32 : index
    %328 = vector.load %arg6[%c0_80, %c32_81] : memref<16x64xf32, #tpu.memory_space<vmem>>, vector<2x32xf32>
    tpu.vector_store %arg6[%c0_80, %c32_81], %327 {strides = array<i32>} : memref<16x64xf32, #tpu.memory_space<vmem>>, vector<2x32xf32>,
    %c0_82 = arith.constant 0 : index
    %c0_83 = arith.constant 0 : index
    %329 = vector.load %arg6[%c0_82, %c0_83] : memref<16x64xf32, #tpu.memory_space<vmem>>, vector<16x64xf32>
    %c1_84 = arith.constant 1 : index
    %c0_85 = arith.constant 0 : index
    %c0_86 = arith.constant 0 : index
    %330 = vector.load %arg1[%c1_84, %c0_85, %c0_86] : memref<2x64x192xf32, #tpu.memory_space<vmem>>, vector<1x64x192xf32>
    %331 = vector.shape_cast %330 : vector<1x64x192xf32> to vector<64x192xf32>
    %cst_87 = arith.constant dense<0.000000e+00> : vector<16x192xf32>
    %332 = tpu.matmul %329, %331, %cst_87 {dimension_numbers = #tpu.dot_dimension_numbers<[1], [0], [0], [1], [0, 0, 1, 1], [], []>} : vector<16x64xf32>, vector<64x192xf32>, vector<16x192xf32> -> vector<16x192xf32>
    %c2_88 = arith.constant 2 : index
    %c0_89 = arith.constant 0 : index
    %333 = vector.load %arg4[%c2_88, %c0_89] : memref<7x192xf32, #tpu.memory_space<vmem>>, vector<1x192xf32>
    %334 = vector.broadcast %333 : vector<1x192xf32> to vector<16x192xf32>
    %335 = arith.addf %332, %334 : vector<16x192xf32>
    %c1_90 = arith.constant 1 : index
    %c0_91 = arith.constant 0 : index
    %c0_92 = arith.constant 0 : index
    %336 = vector.load %arg2[%c1_90, %c0_91, %c0_92] : memref<2x64x192xf32, #tpu.memory_space<vmem>>, vector<1x64x192xf32>
    %337 = vector.shape_cast %336 : vector<1x64x192xf32> to vector<64x192xf32>
    %c4_93 = arith.constant 4 : index
    %c0_94 = arith.constant 0 : index
    %338 = vector.load %arg4[%c4_93, %c0_94] : memref<7x192xf32, #tpu.memory_space<vmem>>, vector<1x64xf32>
    %cst_95 = arith.constant 0.000000e+00 : f32
    %339 = vector.broadcast %cst_95 : f32 to vector<2x64xf32>
    %340 = vector.extract_strided_slice %335 {offsets = [0, 0], sizes = [2, 192], strides = [1, 1]} : vector<16x192xf32> to vector<2x192xf32>
    %341 = vector.extract_strided_slice %335 {offsets = [14, 0], sizes = [2, 192], strides = [1, 1]} : vector<16x192xf32> to vector<2x192xf32>
    %342 = vector.shape_cast %8 : vector<1x192xi1> to vector<1x192xi1>
    %343 = vector.broadcast %342 : vector<1x192xi1> to vector<2x192xi1>
    %344 = arith.select %343, %340, %341 : vector<2x192xi1>, vector<2x192xf32>
    %cst_96 = arith.constant dense<0.000000e+00> : vector<2x192xf32>
    %345 = tpu.matmul %339, %337, %cst_96 {dimension_numbers = #tpu.dot_dimension_numbers<[1], [0], [0], [1], [0, 0, 1, 1], [], []>} : vector<2x64xf32>, vector<64x192xf32>, vector<2x192xf32> -> vector<2x192xf32>
    %346 = vector.extract_strided_slice %344 {offsets = [0, 0], sizes = [2, 64], strides = [1, 1]} : vector<2x192xf32> to vector<2x64xf32>
    %347 = vector.extract_strided_slice %345 {offsets = [0, 0], sizes = [2, 64], strides = [1, 1]} : vector<2x192xf32> to vector<2x64xf32>
    %348 = arith.addf %346, %347 : vector<2x64xf32>
    %349 = arith.negf %348 : vector<2x64xf32>
    %350 = math.exp %349 : vector<2x64xf32>
    %cst_97 = arith.constant 1.000000e+00 : f32
    %351 = vector.broadcast %cst_97 : f32 to vector<2x64xf32>
    %352 = arith.addf %351, %350 : vector<2x64xf32>
    %353 = arith.divf %351, %352 : vector<2x64xf32>
    %354 = vector.extract_strided_slice %344 {offsets = [0, 64], sizes = [2, 64], strides = [1, 1]} : vector<2x192xf32> to vector<2x64xf32>
    %355 = vector.extract_strided_slice %345 {offsets = [0, 64], sizes = [2, 64], strides = [1, 1]} : vector<2x192xf32> to vector<2x64xf32>
    %356 = arith.addf %354, %355 : vector<2x64xf32>
    %357 = arith.negf %356 : vector<2x64xf32>
    %358 = math.exp %357 : vector<2x64xf32>
    %cst_98 = arith.constant 1.000000e+00 : f32
    %359 = vector.broadcast %cst_98 : f32 to vector<2x64xf32>
    %360 = arith.addf %359, %358 : vector<2x64xf32>
    %361 = arith.divf %359, %360 : vector<2x64xf32>
    %362 = vector.extract_strided_slice %344 {offsets = [0, 128], sizes = [2, 64], strides = [1, 1]} : vector<2x192xf32> to vector<2x64xf32>
    %363 = vector.extract_strided_slice %345 {offsets = [0, 128], sizes = [2, 64], strides = [1, 1]} : vector<2x192xf32> to vector<2x64xf32>
    %364 = vector.broadcast %338 : vector<1x64xf32> to vector<2x64xf32>
    %365 = arith.addf %363, %364 : vector<2x64xf32>
    %366 = arith.mulf %353, %365 : vector<2x64xf32>
    %367 = arith.addf %362, %366 : vector<2x64xf32>
    %368 = math.tanh %367 : vector<2x64xf32>
    %cst_99 = arith.constant 1.000000e+00 : f32
    %369 = vector.broadcast %cst_99 : f32 to vector<2x64xf32>
    %370 = arith.subf %369, %361 : vector<2x64xf32>
    %371 = arith.mulf %370, %368 : vector<2x64xf32>
    %372 = arith.mulf %361, %339 : vector<2x64xf32>
    %373 = arith.addf %371, %372 : vector<2x64xf32>
    %374 = vector.extract_strided_slice %373 {offsets = [0, 0], sizes = [2, 32], strides = [1, 1]} : vector<2x64xf32> to vector<2x32xf32>
    %c0_100 = arith.constant 0 : index
    %c0_101 = arith.constant 0 : index
    %375 = vector.load %arg7[%c0_100, %c0_101] : memref<16x64xf32, #tpu.memory_space<vmem>>, vector<2x32xf32>
    tpu.vector_store %arg7[%c0_100, %c0_101], %374 {strides = array<i32>} : memref<16x64xf32, #tpu.memory_space<vmem>>, vector<2x32xf32>,
    %376 = vector.extract_strided_slice %373 {offsets = [0, 32], sizes = [2, 32], strides = [1, 1]} : vector<2x64xf32> to vector<2x32xf32>
    %c14_102 = arith.constant 14 : index
    %c32_103 = arith.constant 32 : index
    %377 = vector.load %arg7[%c14_102, %c32_103] : memref<16x64xf32, #tpu.memory_space<vmem>>, vector<2x32xf32>
    tpu.vector_store %arg7[%c14_102, %c32_103], %376 {strides = array<i32>} : memref<16x64xf32, #tpu.memory_space<vmem>>, vector<2x32xf32>,
    %378 = vector.extract_strided_slice %335 {offsets = [2, 0], sizes = [2, 192], strides = [1, 1]} : vector<16x192xf32> to vector<2x192xf32>
    %379 = vector.extract_strided_slice %335 {offsets = [12, 0], sizes = [2, 192], strides = [1, 1]} : vector<16x192xf32> to vector<2x192xf32>
    %380 = vector.shape_cast %8 : vector<1x192xi1> to vector<1x192xi1>
    %381 = vector.broadcast %380 : vector<1x192xi1> to vector<2x192xi1>
    %382 = arith.select %381, %378, %379 : vector<2x192xi1>, vector<2x192xf32>
    %cst_104 = arith.constant dense<0.000000e+00> : vector<2x192xf32>
    %383 = tpu.matmul %373, %337, %cst_104 {dimension_numbers = #tpu.dot_dimension_numbers<[1], [0], [0], [1], [0, 0, 1, 1], [], []>} : vector<2x64xf32>, vector<64x192xf32>, vector<2x192xf32> -> vector<2x192xf32>
    %384 = vector.extract_strided_slice %382 {offsets = [0, 0], sizes = [2, 64], strides = [1, 1]} : vector<2x192xf32> to vector<2x64xf32>
    %385 = vector.extract_strided_slice %383 {offsets = [0, 0], sizes = [2, 64], strides = [1, 1]} : vector<2x192xf32> to vector<2x64xf32>
    %386 = arith.addf %384, %385 : vector<2x64xf32>
    %387 = arith.negf %386 : vector<2x64xf32>
    %388 = math.exp %387 : vector<2x64xf32>
    %cst_105 = arith.constant 1.000000e+00 : f32
    %389 = vector.broadcast %cst_105 : f32 to vector<2x64xf32>
    %390 = arith.addf %389, %388 : vector<2x64xf32>
    %391 = arith.divf %389, %390 : vector<2x64xf32>
    %392 = vector.extract_strided_slice %382 {offsets = [0, 64], sizes = [2, 64], strides = [1, 1]} : vector<2x192xf32> to vector<2x64xf32>
    %393 = vector.extract_strided_slice %383 {offsets = [0, 64], sizes = [2, 64], strides = [1, 1]} : vector<2x192xf32> to vector<2x64xf32>
    %394 = arith.addf %392, %393 : vector<2x64xf32>
    %395 = arith.negf %394 : vector<2x64xf32>
    %396 = math.exp %395 : vector<2x64xf32>
    %cst_106 = arith.constant 1.000000e+00 : f32
    %397 = vector.broadcast %cst_106 : f32 to vector<2x64xf32>
    %398 = arith.addf %397, %396 : vector<2x64xf32>
    %399 = arith.divf %397, %398 : vector<2x64xf32>
    %400 = vector.extract_strided_slice %382 {offsets = [0, 128], sizes = [2, 64], strides = [1, 1]} : vector<2x192xf32> to vector<2x64xf32>
    %401 = vector.extract_strided_slice %383 {offsets = [0, 128], sizes = [2, 64], strides = [1, 1]} : vector<2x192xf32> to vector<2x64xf32>
    %402 = vector.broadcast %338 : vector<1x64xf32> to vector<2x64xf32>
    %403 = arith.addf %401, %402 : vector<2x64xf32>
    %404 = arith.mulf %391, %403 : vector<2x64xf32>
    %405 = arith.addf %400, %404 : vector<2x64xf32>
    %406 = math.tanh %405 : vector<2x64xf32>
    %cst_107 = arith.constant 1.000000e+00 : f32
    %407 = vector.broadcast %cst_107 : f32 to vector<2x64xf32>
    %408 = arith.subf %407, %399 : vector<2x64xf32>
    %409 = arith.mulf %408, %406 : vector<2x64xf32>
    %410 = arith.mulf %399, %373 : vector<2x64xf32>
    %411 = arith.addf %409, %410 : vector<2x64xf32>
    %412 = vector.extract_strided_slice %411 {offsets = [0, 0], sizes = [2, 32], strides = [1, 1]} : vector<2x64xf32> to vector<2x32xf32>
    %c2_108 = arith.constant 2 : index
    %c0_109 = arith.constant 0 : index
    %413 = vector.load %arg7[%c2_108, %c0_109] : memref<16x64xf32, #tpu.memory_space<vmem>>, vector<2x32xf32>
    tpu.vector_store %arg7[%c2_108, %c0_109], %412 {strides = array<i32>} : memref<16x64xf32, #tpu.memory_space<vmem>>, vector<2x32xf32>,
    %414 = vector.extract_strided_slice %411 {offsets = [0, 32], sizes = [2, 32], strides = [1, 1]} : vector<2x64xf32> to vector<2x32xf32>
    %c12_110 = arith.constant 12 : index
    %c32_111 = arith.constant 32 : index
    %415 = vector.load %arg7[%c12_110, %c32_111] : memref<16x64xf32, #tpu.memory_space<vmem>>, vector<2x32xf32>
    tpu.vector_store %arg7[%c12_110, %c32_111], %414 {strides = array<i32>} : memref<16x64xf32, #tpu.memory_space<vmem>>, vector<2x32xf32>,
    %416 = vector.extract_strided_slice %335 {offsets = [4, 0], sizes = [2, 192], strides = [1, 1]} : vector<16x192xf32> to vector<2x192xf32>
    %417 = vector.extract_strided_slice %335 {offsets = [10, 0], sizes = [2, 192], strides = [1, 1]} : vector<16x192xf32> to vector<2x192xf32>
    %418 = vector.shape_cast %8 : vector<1x192xi1> to vector<1x192xi1>
    %419 = vector.broadcast %418 : vector<1x192xi1> to vector<2x192xi1>
    %420 = arith.select %419, %416, %417 : vector<2x192xi1>, vector<2x192xf32>
    %cst_112 = arith.constant dense<0.000000e+00> : vector<2x192xf32>
    %421 = tpu.matmul %411, %337, %cst_112 {dimension_numbers = #tpu.dot_dimension_numbers<[1], [0], [0], [1], [0, 0, 1, 1], [], []>} : vector<2x64xf32>, vector<64x192xf32>, vector<2x192xf32> -> vector<2x192xf32>
    %422 = vector.extract_strided_slice %420 {offsets = [0, 0], sizes = [2, 64], strides = [1, 1]} : vector<2x192xf32> to vector<2x64xf32>
    %423 = vector.extract_strided_slice %421 {offsets = [0, 0], sizes = [2, 64], strides = [1, 1]} : vector<2x192xf32> to vector<2x64xf32>
    %424 = arith.addf %422, %423 : vector<2x64xf32>
    %425 = arith.negf %424 : vector<2x64xf32>
    %426 = math.exp %425 : vector<2x64xf32>
    %cst_113 = arith.constant 1.000000e+00 : f32
    %427 = vector.broadcast %cst_113 : f32 to vector<2x64xf32>
    %428 = arith.addf %427, %426 : vector<2x64xf32>
    %429 = arith.divf %427, %428 : vector<2x64xf32>
    %430 = vector.extract_strided_slice %420 {offsets = [0, 64], sizes = [2, 64], strides = [1, 1]} : vector<2x192xf32> to vector<2x64xf32>
    %431 = vector.extract_strided_slice %421 {offsets = [0, 64], sizes = [2, 64], strides = [1, 1]} : vector<2x192xf32> to vector<2x64xf32>
    %432 = arith.addf %430, %431 : vector<2x64xf32>
    %433 = arith.negf %432 : vector<2x64xf32>
    %434 = math.exp %433 : vector<2x64xf32>
    %cst_114 = arith.constant 1.000000e+00 : f32
    %435 = vector.broadcast %cst_114 : f32 to vector<2x64xf32>
    %436 = arith.addf %435, %434 : vector<2x64xf32>
    %437 = arith.divf %435, %436 : vector<2x64xf32>
    %438 = vector.extract_strided_slice %420 {offsets = [0, 128], sizes = [2, 64], strides = [1, 1]} : vector<2x192xf32> to vector<2x64xf32>
    %439 = vector.extract_strided_slice %421 {offsets = [0, 128], sizes = [2, 64], strides = [1, 1]} : vector<2x192xf32> to vector<2x64xf32>
    %440 = vector.broadcast %338 : vector<1x64xf32> to vector<2x64xf32>
    %441 = arith.addf %439, %440 : vector<2x64xf32>
    %442 = arith.mulf %429, %441 : vector<2x64xf32>
    %443 = arith.addf %438, %442 : vector<2x64xf32>
    %444 = math.tanh %443 : vector<2x64xf32>
    %cst_115 = arith.constant 1.000000e+00 : f32
    %445 = vector.broadcast %cst_115 : f32 to vector<2x64xf32>
    %446 = arith.subf %445, %437 : vector<2x64xf32>
    %447 = arith.mulf %446, %444 : vector<2x64xf32>
    %448 = arith.mulf %437, %411 : vector<2x64xf32>
    %449 = arith.addf %447, %448 : vector<2x64xf32>
    %450 = vector.extract_strided_slice %449 {offsets = [0, 0], sizes = [2, 32], strides = [1, 1]} : vector<2x64xf32> to vector<2x32xf32>
    %c4_116 = arith.constant 4 : index
    %c0_117 = arith.constant 0 : index
    %451 = vector.load %arg7[%c4_116, %c0_117] : memref<16x64xf32, #tpu.memory_space<vmem>>, vector<2x32xf32>
    tpu.vector_store %arg7[%c4_116, %c0_117], %450 {strides = array<i32>} : memref<16x64xf32, #tpu.memory_space<vmem>>, vector<2x32xf32>,
    %452 = vector.extract_strided_slice %449 {offsets = [0, 32], sizes = [2, 32], strides = [1, 1]} : vector<2x64xf32> to vector<2x32xf32>
    %c10_118 = arith.constant 10 : index
    %c32_119 = arith.constant 32 : index
    %453 = vector.load %arg7[%c10_118, %c32_119] : memref<16x64xf32, #tpu.memory_space<vmem>>, vector<2x32xf32>
    tpu.vector_store %arg7[%c10_118, %c32_119], %452 {strides = array<i32>} : memref<16x64xf32, #tpu.memory_space<vmem>>, vector<2x32xf32>,
    %454 = vector.extract_strided_slice %335 {offsets = [6, 0], sizes = [2, 192], strides = [1, 1]} : vector<16x192xf32> to vector<2x192xf32>
    %455 = vector.extract_strided_slice %335 {offsets = [8, 0], sizes = [2, 192], strides = [1, 1]} : vector<16x192xf32> to vector<2x192xf32>
    %456 = vector.shape_cast %8 : vector<1x192xi1> to vector<1x192xi1>
    %457 = vector.broadcast %456 : vector<1x192xi1> to vector<2x192xi1>
    %458 = arith.select %457, %454, %455 : vector<2x192xi1>, vector<2x192xf32>
    %cst_120 = arith.constant dense<0.000000e+00> : vector<2x192xf32>
    %459 = tpu.matmul %449, %337, %cst_120 {dimension_numbers = #tpu.dot_dimension_numbers<[1], [0], [0], [1], [0, 0, 1, 1], [], []>} : vector<2x64xf32>, vector<64x192xf32>, vector<2x192xf32> -> vector<2x192xf32>
    %460 = vector.extract_strided_slice %458 {offsets = [0, 0], sizes = [2, 64], strides = [1, 1]} : vector<2x192xf32> to vector<2x64xf32>
    %461 = vector.extract_strided_slice %459 {offsets = [0, 0], sizes = [2, 64], strides = [1, 1]} : vector<2x192xf32> to vector<2x64xf32>
    %462 = arith.addf %460, %461 : vector<2x64xf32>
    %463 = arith.negf %462 : vector<2x64xf32>
    %464 = math.exp %463 : vector<2x64xf32>
    %cst_121 = arith.constant 1.000000e+00 : f32
    %465 = vector.broadcast %cst_121 : f32 to vector<2x64xf32>
    %466 = arith.addf %465, %464 : vector<2x64xf32>
    %467 = arith.divf %465, %466 : vector<2x64xf32>
    %468 = vector.extract_strided_slice %458 {offsets = [0, 64], sizes = [2, 64], strides = [1, 1]} : vector<2x192xf32> to vector<2x64xf32>
    %469 = vector.extract_strided_slice %459 {offsets = [0, 64], sizes = [2, 64], strides = [1, 1]} : vector<2x192xf32> to vector<2x64xf32>
    %470 = arith.addf %468, %469 : vector<2x64xf32>
    %471 = arith.negf %470 : vector<2x64xf32>
    %472 = math.exp %471 : vector<2x64xf32>
    %cst_122 = arith.constant 1.000000e+00 : f32
    %473 = vector.broadcast %cst_122 : f32 to vector<2x64xf32>
    %474 = arith.addf %473, %472 : vector<2x64xf32>
    %475 = arith.divf %473, %474 : vector<2x64xf32>
    %476 = vector.extract_strided_slice %458 {offsets = [0, 128], sizes = [2, 64], strides = [1, 1]} : vector<2x192xf32> to vector<2x64xf32>
    %477 = vector.extract_strided_slice %459 {offsets = [0, 128], sizes = [2, 64], strides = [1, 1]} : vector<2x192xf32> to vector<2x64xf32>
    %478 = vector.broadcast %338 : vector<1x64xf32> to vector<2x64xf32>
    %479 = arith.addf %477, %478 : vector<2x64xf32>
    %480 = arith.mulf %467, %479 : vector<2x64xf32>
    %481 = arith.addf %476, %480 : vector<2x64xf32>
    %482 = math.tanh %481 : vector<2x64xf32>
    %cst_123 = arith.constant 1.000000e+00 : f32
    %483 = vector.broadcast %cst_123 : f32 to vector<2x64xf32>
    %484 = arith.subf %483, %475 : vector<2x64xf32>
    %485 = arith.mulf %484, %482 : vector<2x64xf32>
    %486 = arith.mulf %475, %449 : vector<2x64xf32>
    %487 = arith.addf %485, %486 : vector<2x64xf32>
    %488 = vector.extract_strided_slice %487 {offsets = [0, 0], sizes = [2, 32], strides = [1, 1]} : vector<2x64xf32> to vector<2x32xf32>
    %c6_124 = arith.constant 6 : index
    %c0_125 = arith.constant 0 : index
    %489 = vector.load %arg7[%c6_124, %c0_125] : memref<16x64xf32, #tpu.memory_space<vmem>>, vector<2x32xf32>
    tpu.vector_store %arg7[%c6_124, %c0_125], %488 {strides = array<i32>} : memref<16x64xf32, #tpu.memory_space<vmem>>, vector<2x32xf32>,
    %490 = vector.extract_strided_slice %487 {offsets = [0, 32], sizes = [2, 32], strides = [1, 1]} : vector<2x64xf32> to vector<2x32xf32>
    %c8_126 = arith.constant 8 : index
    %c32_127 = arith.constant 32 : index
    %491 = vector.load %arg7[%c8_126, %c32_127] : memref<16x64xf32, #tpu.memory_space<vmem>>, vector<2x32xf32>
    tpu.vector_store %arg7[%c8_126, %c32_127], %490 {strides = array<i32>} : memref<16x64xf32, #tpu.memory_space<vmem>>, vector<2x32xf32>,
    %492 = vector.extract_strided_slice %335 {offsets = [8, 0], sizes = [2, 192], strides = [1, 1]} : vector<16x192xf32> to vector<2x192xf32>
    %493 = vector.extract_strided_slice %335 {offsets = [6, 0], sizes = [2, 192], strides = [1, 1]} : vector<16x192xf32> to vector<2x192xf32>
    %494 = vector.shape_cast %8 : vector<1x192xi1> to vector<1x192xi1>
    %495 = vector.broadcast %494 : vector<1x192xi1> to vector<2x192xi1>
    %496 = arith.select %495, %492, %493 : vector<2x192xi1>, vector<2x192xf32>
    %cst_128 = arith.constant dense<0.000000e+00> : vector<2x192xf32>
    %497 = tpu.matmul %487, %337, %cst_128 {dimension_numbers = #tpu.dot_dimension_numbers<[1], [0], [0], [1], [0, 0, 1, 1], [], []>} : vector<2x64xf32>, vector<64x192xf32>, vector<2x192xf32> -> vector<2x192xf32>
    %498 = vector.extract_strided_slice %496 {offsets = [0, 0], sizes = [2, 64], strides = [1, 1]} : vector<2x192xf32> to vector<2x64xf32>
    %499 = vector.extract_strided_slice %497 {offsets = [0, 0], sizes = [2, 64], strides = [1, 1]} : vector<2x192xf32> to vector<2x64xf32>
    %500 = arith.addf %498, %499 : vector<2x64xf32>
    %501 = arith.negf %500 : vector<2x64xf32>
    %502 = math.exp %501 : vector<2x64xf32>
    %cst_129 = arith.constant 1.000000e+00 : f32
    %503 = vector.broadcast %cst_129 : f32 to vector<2x64xf32>
    %504 = arith.addf %503, %502 : vector<2x64xf32>
    %505 = arith.divf %503, %504 : vector<2x64xf32>
    %506 = vector.extract_strided_slice %496 {offsets = [0, 64], sizes = [2, 64], strides = [1, 1]} : vector<2x192xf32> to vector<2x64xf32>
    %507 = vector.extract_strided_slice %497 {offsets = [0, 64], sizes = [2, 64], strides = [1, 1]} : vector<2x192xf32> to vector<2x64xf32>
    %508 = arith.addf %506, %507 : vector<2x64xf32>
    %509 = arith.negf %508 : vector<2x64xf32>
    %510 = math.exp %509 : vector<2x64xf32>
    %cst_130 = arith.constant 1.000000e+00 : f32
    %511 = vector.broadcast %cst_130 : f32 to vector<2x64xf32>
    %512 = arith.addf %511, %510 : vector<2x64xf32>
    %513 = arith.divf %511, %512 : vector<2x64xf32>
    %514 = vector.extract_strided_slice %496 {offsets = [0, 128], sizes = [2, 64], strides = [1, 1]} : vector<2x192xf32> to vector<2x64xf32>
    %515 = vector.extract_strided_slice %497 {offsets = [0, 128], sizes = [2, 64], strides = [1, 1]} : vector<2x192xf32> to vector<2x64xf32>
    %516 = vector.broadcast %338 : vector<1x64xf32> to vector<2x64xf32>
    %517 = arith.addf %515, %516 : vector<2x64xf32>
    %518 = arith.mulf %505, %517 : vector<2x64xf32>
    %519 = arith.addf %514, %518 : vector<2x64xf32>
    %520 = math.tanh %519 : vector<2x64xf32>
    %cst_131 = arith.constant 1.000000e+00 : f32
    %521 = vector.broadcast %cst_131 : f32 to vector<2x64xf32>
    %522 = arith.subf %521, %513 : vector<2x64xf32>
    %523 = arith.mulf %522, %520 : vector<2x64xf32>
    %524 = arith.mulf %513, %487 : vector<2x64xf32>
    %525 = arith.addf %523, %524 : vector<2x64xf32>
    %526 = vector.extract_strided_slice %525 {offsets = [0, 0], sizes = [2, 32], strides = [1, 1]} : vector<2x64xf32> to vector<2x32xf32>
    %c8_132 = arith.constant 8 : index
    %c0_133 = arith.constant 0 : index
    %527 = vector.load %arg7[%c8_132, %c0_133] : memref<16x64xf32, #tpu.memory_space<vmem>>, vector<2x32xf32>
    tpu.vector_store %arg7[%c8_132, %c0_133], %526 {strides = array<i32>} : memref<16x64xf32, #tpu.memory_space<vmem>>, vector<2x32xf32>,
    %528 = vector.extract_strided_slice %525 {offsets = [0, 32], sizes = [2, 32], strides = [1, 1]} : vector<2x64xf32> to vector<2x32xf32>
    %c6_134 = arith.constant 6 : index
    %c32_135 = arith.constant 32 : index
    %529 = vector.load %arg7[%c6_134, %c32_135] : memref<16x64xf32, #tpu.memory_space<vmem>>, vector<2x32xf32>
    tpu.vector_store %arg7[%c6_134, %c32_135], %528 {strides = array<i32>} : memref<16x64xf32, #tpu.memory_space<vmem>>, vector<2x32xf32>,
    %530 = vector.extract_strided_slice %335 {offsets = [10, 0], sizes = [2, 192], strides = [1, 1]} : vector<16x192xf32> to vector<2x192xf32>
    %531 = vector.extract_strided_slice %335 {offsets = [4, 0], sizes = [2, 192], strides = [1, 1]} : vector<16x192xf32> to vector<2x192xf32>
    %532 = vector.shape_cast %8 : vector<1x192xi1> to vector<1x192xi1>
    %533 = vector.broadcast %532 : vector<1x192xi1> to vector<2x192xi1>
    %534 = arith.select %533, %530, %531 : vector<2x192xi1>, vector<2x192xf32>
    %cst_136 = arith.constant dense<0.000000e+00> : vector<2x192xf32>
    %535 = tpu.matmul %525, %337, %cst_136 {dimension_numbers = #tpu.dot_dimension_numbers<[1], [0], [0], [1], [0, 0, 1, 1], [], []>} : vector<2x64xf32>, vector<64x192xf32>, vector<2x192xf32> -> vector<2x192xf32>
    %536 = vector.extract_strided_slice %534 {offsets = [0, 0], sizes = [2, 64], strides = [1, 1]} : vector<2x192xf32> to vector<2x64xf32>
    %537 = vector.extract_strided_slice %535 {offsets = [0, 0], sizes = [2, 64], strides = [1, 1]} : vector<2x192xf32> to vector<2x64xf32>
    %538 = arith.addf %536, %537 : vector<2x64xf32>
    %539 = arith.negf %538 : vector<2x64xf32>
    %540 = math.exp %539 : vector<2x64xf32>
    %cst_137 = arith.constant 1.000000e+00 : f32
    %541 = vector.broadcast %cst_137 : f32 to vector<2x64xf32>
    %542 = arith.addf %541, %540 : vector<2x64xf32>
    %543 = arith.divf %541, %542 : vector<2x64xf32>
    %544 = vector.extract_strided_slice %534 {offsets = [0, 64], sizes = [2, 64], strides = [1, 1]} : vector<2x192xf32> to vector<2x64xf32>
    %545 = vector.extract_strided_slice %535 {offsets = [0, 64], sizes = [2, 64], strides = [1, 1]} : vector<2x192xf32> to vector<2x64xf32>
    %546 = arith.addf %544, %545 : vector<2x64xf32>
    %547 = arith.negf %546 : vector<2x64xf32>
    %548 = math.exp %547 : vector<2x64xf32>
    %cst_138 = arith.constant 1.000000e+00 : f32
    %549 = vector.broadcast %cst_138 : f32 to vector<2x64xf32>
    %550 = arith.addf %549, %548 : vector<2x64xf32>
    %551 = arith.divf %549, %550 : vector<2x64xf32>
    %552 = vector.extract_strided_slice %534 {offsets = [0, 128], sizes = [2, 64], strides = [1, 1]} : vector<2x192xf32> to vector<2x64xf32>
    %553 = vector.extract_strided_slice %535 {offsets = [0, 128], sizes = [2, 64], strides = [1, 1]} : vector<2x192xf32> to vector<2x64xf32>
    %554 = vector.broadcast %338 : vector<1x64xf32> to vector<2x64xf32>
    %555 = arith.addf %553, %554 : vector<2x64xf32>
    %556 = arith.mulf %543, %555 : vector<2x64xf32>
    %557 = arith.addf %552, %556 : vector<2x64xf32>
    %558 = math.tanh %557 : vector<2x64xf32>
    %cst_139 = arith.constant 1.000000e+00 : f32
    %559 = vector.broadcast %cst_139 : f32 to vector<2x64xf32>
    %560 = arith.subf %559, %551 : vector<2x64xf32>
    %561 = arith.mulf %560, %558 : vector<2x64xf32>
    %562 = arith.mulf %551, %525 : vector<2x64xf32>
    %563 = arith.addf %561, %562 : vector<2x64xf32>
    %564 = vector.extract_strided_slice %563 {offsets = [0, 0], sizes = [2, 32], strides = [1, 1]} : vector<2x64xf32> to vector<2x32xf32>
    %c10_140 = arith.constant 10 : index
    %c0_141 = arith.constant 0 : index
    %565 = vector.load %arg7[%c10_140, %c0_141] : memref<16x64xf32, #tpu.memory_space<vmem>>, vector<2x32xf32>
    tpu.vector_store %arg7[%c10_140, %c0_141], %564 {strides = array<i32>} : memref<16x64xf32, #tpu.memory_space<vmem>>, vector<2x32xf32>,
    %566 = vector.extract_strided_slice %563 {offsets = [0, 32], sizes = [2, 32], strides = [1, 1]} : vector<2x64xf32> to vector<2x32xf32>
    %c4_142 = arith.constant 4 : index
    %c32_143 = arith.constant 32 : index
    %567 = vector.load %arg7[%c4_142, %c32_143] : memref<16x64xf32, #tpu.memory_space<vmem>>, vector<2x32xf32>
    tpu.vector_store %arg7[%c4_142, %c32_143], %566 {strides = array<i32>} : memref<16x64xf32, #tpu.memory_space<vmem>>, vector<2x32xf32>,
    %568 = vector.extract_strided_slice %335 {offsets = [12, 0], sizes = [2, 192], strides = [1, 1]} : vector<16x192xf32> to vector<2x192xf32>
    %569 = vector.extract_strided_slice %335 {offsets = [2, 0], sizes = [2, 192], strides = [1, 1]} : vector<16x192xf32> to vector<2x192xf32>
    %570 = vector.shape_cast %8 : vector<1x192xi1> to vector<1x192xi1>
    %571 = vector.broadcast %570 : vector<1x192xi1> to vector<2x192xi1>
    %572 = arith.select %571, %568, %569 : vector<2x192xi1>, vector<2x192xf32>
    %cst_144 = arith.constant dense<0.000000e+00> : vector<2x192xf32>
    %573 = tpu.matmul %563, %337, %cst_144 {dimension_numbers = #tpu.dot_dimension_numbers<[1], [0], [0], [1], [0, 0, 1, 1], [], []>} : vector<2x64xf32>, vector<64x192xf32>, vector<2x192xf32> -> vector<2x192xf32>
    %574 = vector.extract_strided_slice %572 {offsets = [0, 0], sizes = [2, 64], strides = [1, 1]} : vector<2x192xf32> to vector<2x64xf32>
    %575 = vector.extract_strided_slice %573 {offsets = [0, 0], sizes = [2, 64], strides = [1, 1]} : vector<2x192xf32> to vector<2x64xf32>
    %576 = arith.addf %574, %575 : vector<2x64xf32>
    %577 = arith.negf %576 : vector<2x64xf32>
    %578 = math.exp %577 : vector<2x64xf32>
    %cst_145 = arith.constant 1.000000e+00 : f32
    %579 = vector.broadcast %cst_145 : f32 to vector<2x64xf32>
    %580 = arith.addf %579, %578 : vector<2x64xf32>
    %581 = arith.divf %579, %580 : vector<2x64xf32>
    %582 = vector.extract_strided_slice %572 {offsets = [0, 64], sizes = [2, 64], strides = [1, 1]} : vector<2x192xf32> to vector<2x64xf32>
    %583 = vector.extract_strided_slice %573 {offsets = [0, 64], sizes = [2, 64], strides = [1, 1]} : vector<2x192xf32> to vector<2x64xf32>
    %584 = arith.addf %582, %583 : vector<2x64xf32>
    %585 = arith.negf %584 : vector<2x64xf32>
    %586 = math.exp %585 : vector<2x64xf32>
    %cst_146 = arith.constant 1.000000e+00 : f32
    %587 = vector.broadcast %cst_146 : f32 to vector<2x64xf32>
    %588 = arith.addf %587, %586 : vector<2x64xf32>
    %589 = arith.divf %587, %588 : vector<2x64xf32>
    %590 = vector.extract_strided_slice %572 {offsets = [0, 128], sizes = [2, 64], strides = [1, 1]} : vector<2x192xf32> to vector<2x64xf32>
    %591 = vector.extract_strided_slice %573 {offsets = [0, 128], sizes = [2, 64], strides = [1, 1]} : vector<2x192xf32> to vector<2x64xf32>
    %592 = vector.broadcast %338 : vector<1x64xf32> to vector<2x64xf32>
    %593 = arith.addf %591, %592 : vector<2x64xf32>
    %594 = arith.mulf %581, %593 : vector<2x64xf32>
    %595 = arith.addf %590, %594 : vector<2x64xf32>
    %596 = math.tanh %595 : vector<2x64xf32>
    %cst_147 = arith.constant 1.000000e+00 : f32
    %597 = vector.broadcast %cst_147 : f32 to vector<2x64xf32>
    %598 = arith.subf %597, %589 : vector<2x64xf32>
    %599 = arith.mulf %598, %596 : vector<2x64xf32>
    %600 = arith.mulf %589, %563 : vector<2x64xf32>
    %601 = arith.addf %599, %600 : vector<2x64xf32>
    %602 = vector.extract_strided_slice %601 {offsets = [0, 0], sizes = [2, 32], strides = [1, 1]} : vector<2x64xf32> to vector<2x32xf32>
    %c12_148 = arith.constant 12 : index
    %c0_149 = arith.constant 0 : index
    %603 = vector.load %arg7[%c12_148, %c0_149] : memref<16x64xf32, #tpu.memory_space<vmem>>, vector<2x32xf32>
    tpu.vector_store %arg7[%c12_148, %c0_149], %602 {strides = array<i32>} : memref<16x64xf32, #tpu.memory_space<vmem>>, vector<2x32xf32>,
    %604 = vector.extract_strided_slice %601 {offsets = [0, 32], sizes = [2, 32], strides = [1, 1]} : vector<2x64xf32> to vector<2x32xf32>
    %c2_150 = arith.constant 2 : index
    %c32_151 = arith.constant 32 : index
    %605 = vector.load %arg7[%c2_150, %c32_151] : memref<16x64xf32, #tpu.memory_space<vmem>>, vector<2x32xf32>
    tpu.vector_store %arg7[%c2_150, %c32_151], %604 {strides = array<i32>} : memref<16x64xf32, #tpu.memory_space<vmem>>, vector<2x32xf32>,
    %606 = vector.extract_strided_slice %335 {offsets = [14, 0], sizes = [2, 192], strides = [1, 1]} : vector<16x192xf32> to vector<2x192xf32>
    %607 = vector.extract_strided_slice %335 {offsets = [0, 0], sizes = [2, 192], strides = [1, 1]} : vector<16x192xf32> to vector<2x192xf32>
    %608 = vector.shape_cast %8 : vector<1x192xi1> to vector<1x192xi1>
    %609 = vector.broadcast %608 : vector<1x192xi1> to vector<2x192xi1>
    %610 = arith.select %609, %606, %607 : vector<2x192xi1>, vector<2x192xf32>
    %cst_152 = arith.constant dense<0.000000e+00> : vector<2x192xf32>
    %611 = tpu.matmul %601, %337, %cst_152 {dimension_numbers = #tpu.dot_dimension_numbers<[1], [0], [0], [1], [0, 0, 1, 1], [], []>} : vector<2x64xf32>, vector<64x192xf32>, vector<2x192xf32> -> vector<2x192xf32>
    %612 = vector.extract_strided_slice %610 {offsets = [0, 0], sizes = [2, 64], strides = [1, 1]} : vector<2x192xf32> to vector<2x64xf32>
    %613 = vector.extract_strided_slice %611 {offsets = [0, 0], sizes = [2, 64], strides = [1, 1]} : vector<2x192xf32> to vector<2x64xf32>
    %614 = arith.addf %612, %613 : vector<2x64xf32>
    %615 = arith.negf %614 : vector<2x64xf32>
    %616 = math.exp %615 : vector<2x64xf32>
    %cst_153 = arith.constant 1.000000e+00 : f32
    %617 = vector.broadcast %cst_153 : f32 to vector<2x64xf32>
    %618 = arith.addf %617, %616 : vector<2x64xf32>
    %619 = arith.divf %617, %618 : vector<2x64xf32>
    %620 = vector.extract_strided_slice %610 {offsets = [0, 64], sizes = [2, 64], strides = [1, 1]} : vector<2x192xf32> to vector<2x64xf32>
    %621 = vector.extract_strided_slice %611 {offsets = [0, 64], sizes = [2, 64], strides = [1, 1]} : vector<2x192xf32> to vector<2x64xf32>
    %622 = arith.addf %620, %621 : vector<2x64xf32>
    %623 = arith.negf %622 : vector<2x64xf32>
    %624 = math.exp %623 : vector<2x64xf32>
    %cst_154 = arith.constant 1.000000e+00 : f32
    %625 = vector.broadcast %cst_154 : f32 to vector<2x64xf32>
    %626 = arith.addf %625, %624 : vector<2x64xf32>
    %627 = arith.divf %625, %626 : vector<2x64xf32>
    %628 = vector.extract_strided_slice %610 {offsets = [0, 128], sizes = [2, 64], strides = [1, 1]} : vector<2x192xf32> to vector<2x64xf32>
    %629 = vector.extract_strided_slice %611 {offsets = [0, 128], sizes = [2, 64], strides = [1, 1]} : vector<2x192xf32> to vector<2x64xf32>
    %630 = vector.broadcast %338 : vector<1x64xf32> to vector<2x64xf32>
    %631 = arith.addf %629, %630 : vector<2x64xf32>
    %632 = arith.mulf %619, %631 : vector<2x64xf32>
    %633 = arith.addf %628, %632 : vector<2x64xf32>
    %634 = math.tanh %633 : vector<2x64xf32>
    %cst_155 = arith.constant 1.000000e+00 : f32
    %635 = vector.broadcast %cst_155 : f32 to vector<2x64xf32>
    %636 = arith.subf %635, %627 : vector<2x64xf32>
    %637 = arith.mulf %636, %634 : vector<2x64xf32>
    %638 = arith.mulf %627, %601 : vector<2x64xf32>
    %639 = arith.addf %637, %638 : vector<2x64xf32>
    %640 = vector.extract_strided_slice %639 {offsets = [0, 0], sizes = [2, 32], strides = [1, 1]} : vector<2x64xf32> to vector<2x32xf32>
    %c14_156 = arith.constant 14 : index
    %c0_157 = arith.constant 0 : index
    %641 = vector.load %arg7[%c14_156, %c0_157] : memref<16x64xf32, #tpu.memory_space<vmem>>, vector<2x32xf32>
    tpu.vector_store %arg7[%c14_156, %c0_157], %640 {strides = array<i32>} : memref<16x64xf32, #tpu.memory_space<vmem>>, vector<2x32xf32>,
    %642 = vector.extract_strided_slice %639 {offsets = [0, 32], sizes = [2, 32], strides = [1, 1]} : vector<2x64xf32> to vector<2x32xf32>
    %c0_158 = arith.constant 0 : index
    %c32_159 = arith.constant 32 : index
    %643 = vector.load %arg7[%c0_158, %c32_159] : memref<16x64xf32, #tpu.memory_space<vmem>>, vector<2x32xf32>
    tpu.vector_store %arg7[%c0_158, %c32_159], %642 {strides = array<i32>} : memref<16x64xf32, #tpu.memory_space<vmem>>, vector<2x32xf32>,
    %c0_160 = arith.constant 0 : index
    %c0_161 = arith.constant 0 : index
    %644 = vector.load %arg7[%c0_160, %c0_161] : memref<16x64xf32, #tpu.memory_space<vmem>>, vector<16x64xf32>
    %645 = vector.broadcast %2 : vector<1x64xf32> to vector<16x64xf32>
    %646 = arith.mulf %644, %645 : vector<16x64xf32>
    %cst_162 = arith.constant dense<0.000000e+00> : vector<16xf32>
    %647 = vector.multi_reduction <add>, %646, %cst_162 [1] : vector<16x64xf32> to vector<16xf32>
    %648 = vector.shape_cast %647 : vector<16xf32> to vector<16x1xf32>
    %649 = vector.broadcast %4 : vector<1x1xf32> to vector<16x1xf32>
    %650 = arith.addf %648, %649 : vector<16x1xf32>
    %cst_163 = arith.constant 0.000000e+00 : f32
    %651 = vector.broadcast %cst_163 : f32 to vector<16x1xf32>
    %652 = arith.maximumf %650, %651 : vector<16x1xf32>
    %cst_164 = arith.constant dense<0.000000e+00> : vector<2x1xf32>
    %653 = tpu.matmul %3, %652, %cst_164 {dimension_numbers = #tpu.dot_dimension_numbers<[1], [0], [0], [1], [0, 0, 1, 1], [], []>} : vector<2x16xf32>, vector<16x1xf32>, vector<2x1xf32> -> vector<2x1xf32>
    %654 = vector.broadcast %5 : vector<1x1xf32> to vector<2x1xf32>
    %655 = arith.addf %653, %654 : vector<2x1xf32>
    %c0_165 = arith.constant 0 : index
    %c0_166 = arith.constant 0 : index
    %656 = vector.load %arg5[%c0_165, %c0_166] : memref<2x1xf32, #tpu.memory_space<vmem>>, vector<2x1xf32>
    tpu.vector_store %arg5[%c0_165, %c0_166], %655 {strides = array<i32>} : memref<2x1xf32, #tpu.memory_space<vmem>>, vector<2x1xf32>,
    return
  }
}

</mosaic_0001>

<bundles_post_ra>
// kernel: tpu_custom_call.1
= control target key start
LH: loop header
LB: loop body
LE: loop exit
PB: predicated region body
PF: predicated region fallthrough
CT: control target
= control target key end

     0   :  { %10 = vsyncpa [#allocation5], 0  ;;  %s3358_s0 = inlined_call_operand.vmem [shape: f32[16,4], index: 0, kind: input, shape index: {}]   ;;  %s3359_s1 = inlined_call_operand.hbm [shape: f32[2,64,192], index: 1, kind: input, shape index: {}]   ;;  %s3360_s2 = inlined_call_operand.hbm [shape: f32[2,64,192], index: 2, kind: input, shape index: {}]   ;;  %s3361_s3 = inlined_call_operand.vmem [shape: f32[7,64], index: 3, kind: input, shape index: {}]   ;;  %s3362_s4 = inlined_call_operand.vmem [shape: f32[7,192], index: 4, kind: input, shape index: {}]   ;;  %s3363_s5 = inlined_call_operand.vmem [shape: f32[2,1], index: 5, kind: output, shape index: {}]  }
   0x1   :  { %11 = vsyncpa [#allocation7], 0  ;;  %s2788_s18 = smov [#allocation4]   ;;  %s2740_s22 = scalar_lea.hbm %s3359_s1, 4096 }
   0x2   :  { %s19_s19 = sshll.u32 %s2788_s18, 4  ;;  %p2741_p0 = scmp.ne.s32.totalorder %s3359_s1, %s2740_s22  ;;  %s20_s19 = int_to_ptr.vmem [resolvable:$true] %s19_s19 }
   0x3   :  { %p2744_p1 = scmp.lt.u32.totalorder %s2740_s22, %s3359_s1 }
   0x5   :  { %p2746_p2 = pnand %p2744_p1, %p2741_p0 }
   0x7   :  { %2749 = shalt.err (!%p2746_p2)
}
   0x8   :  { %s2750_s27 = scalar_lea.vmem %s20_s19, 4096  ;;  %p2755_p4 = scmp.lt.s32.totalorder %s20_s19, %s20_s19 }
   0x9   :  { %p2751_p3 = scmp.ne.s32.totalorder %s20_s19, %s2750_s27  ;;  %p2756_p5 = scmp.lt.s32.totalorder %s2750_s27, %s2750_s27 }
   0xb   :  { %p2757_p6 = por %p2756_p5, %p2755_p4 }
   0xd   :  { %p2758_p7 = pnand %p2757_p6, %p2751_p3 }
   0xf   :  { %2761 = shalt.err (!%p2758_p7)
}
  0x10   :  { %s2789_s28 = smov 256   ;;  %s2790_s29 = smov 16  }
  0x11   :  { %25 = dma.hbm_to_vmem [thread:$0]  %s3359_s1, 4096, %s20_s19, [#allocation5], %s2789_s28, %s2789_s28, %s2790_s29  }
  0x12   :  { %s2791_s7 = smov [#allocation6]   ;;  %s2762_s11 = scalar_lea.hbm %s3360_s2, 4096 }
  0x13   :  { %s31_s8 = sshll.u32 %s2791_s7, 4  ;;  %p2763_p8 = scmp.ne.s32.totalorder %s3360_s2, %s2762_s11  ;;  %s32_s8 = int_to_ptr.vmem [resolvable:$true] %s31_s8 }
  0x14   :  { %p2766_p9 = scmp.lt.u32.totalorder %s2762_s11, %s3360_s2 }
  0x16   :  { %p2768_p10 = pnand %p2766_p9, %p2763_p8 }
  0x18   :  { %2771 = shalt.err (!%p2768_p10)
}
  0x19   :  { %s2772_s16 = scalar_lea.vmem %s32_s8, 4096  ;;  %p2777_p12 = scmp.lt.s32.totalorder %s32_s8, %s32_s8 }
  0x1a   :  { %p2773_p11 = scmp.ne.s32.totalorder %s32_s8, %s2772_s16  ;;  %p2778_p13 = scmp.lt.s32.totalorder %s2772_s16, %s2772_s16 }
  0x1c   :  { %p2779_p0 = por %p2778_p13, %p2777_p12 }
  0x1e   :  { %p2780_p1 = pnand %p2779_p0, %p2773_p11 }
  0x20   :  { %2783 = shalt.err (!%p2780_p1)
}
  0x21   :  { %37 = dma.hbm_to_vmem [thread:$0]  %s3360_s2, 4096, %s32_s8, [#allocation7], %s2789_s28, %s2789_s28, %s2790_s29  }
  0x22   :  { %2784 = dma.done.wait [#allocation5], 4096  }
  0x23   :  { %2785 = vsyncadd [#allocation5], 4294963200 }
  0x24   :  { %2786 = dma.done.wait [#allocation7], 4096  }
  0x25   :  { %2787 = vsyncadd [#allocation7], 4294963200  ;;  %vm65_vm0 = vcmask 1043456   ;;  %vm58_vm1 = vcmask 31744   ;;  %v48_v0 = vld [vmem:[%s3361_s3] sm:$0xf]  ;;  %v165_v61 = vlaneseq }
  0x26   :  { %v56_v1 = vld [vmem:[%s3358_s0] sm:$0xff]  ;;  %v57_v2 = vld [vmem:[%s3358_s0 + $0x8] sm:$0xff]  ;;  %2331 = vmatprep.subr.msk.mxu0 %vm65_vm0, %v48_v0  ;;  %v147_v3 = vld [vmem:[#allocation4 + $0x8] sm:$0xff]  ;;  %v2792_v44 = vmov 0.0   ;;  %vm175_vm2 = vcmask 523264   ;;  %s2794_s30 = smov 64  }
  0x27   :  { %2333 = vmatprep.mubr.msk.f32.mxu0 %vm58_vm1, %v56_v1  ;;  %v149_v4 = vld [vmem:[#allocation4 + $0x18] sm:$0xff]  ;;  %v146_v5 = vld [vmem:[#allocation4] sm:$0xff]  ;;  %2332 = vmatpush3.msk.msra.mxu0 %vm65_vm0, %v48_v0  ;;  %v148_v7 = vld [vmem:[#allocation4 + $0x10] sm:$0xff]  ;;  %v166_v62 = vshrl.u32 %v165_v61, 7  ;;  %vm392_vm6 = vcmask 254976   ;;  %vm394_vm7 = vcmask 517376  }
  0x28   :  { %v2343_v6 = vpack.c.bf16 %v149_v4, %v147_v3  ;;  %v151_v8 = vld [vmem:[#allocation4 + $0x28] sm:$0xff]  ;;  %v153_v9 = vld [vmem:[#allocation4 + $0x38] sm:$0xff]  ;;  %2334 = vmatmul.mubr.msk.f32.vlgmr.msra.gmra.mrb[0].mxu0 %vm58_vm1, %v57_v2  ;;  %v2345_v10 = vpack.c.bf16 %v148_v7, %v146_v5  ;;  %v150_v12 = vld [vmem:[#allocation4 + $0x20] sm:$0xff]  ;;  %246 = vmatprep.mubr.f32.mxu1 %v2792_v44  ;;  %v2793_v4 = vmov 0   ;;  %vm506_vm8 = vcmask 257026   ;;  %s2797_s14 = smov 127  }
  0x29   :  { %v2347_v11 = vpack.c.bf16 %v153_v9, %v151_v8  ;;  %v152_v13 = vld [vmem:[#allocation4 + $0x30] sm:$0xff]  ;;  %v155_v14 = vld [vmem:[#allocation4 + $0x48] sm:$0xff]  ;;  %v157_v15 = vld [vmem:[#allocation4 + $0x58] sm:$0xff]  ;;  %362 = vmatprep.mubr.f32.mxu0 %v2792_v44  ;;  %v2917_v0 = vsub.s32 0, %v166_v62  ;;  %v2922_v2 = vsub.s32 1, %v166_v62  ;;  %vm508_vm9 = vcmask 519426  }
  0x2a   :  { %2344 = vmatprep.subr.bf16.mxu1 %v2343_v6  ;;  %v260_v16 = vld [vmem:[#allocation6 + $0x8] sm:$0xff]  ;;  %v262_v17 = vld [vmem:[#allocation6 + $0x18] sm:$0xff]  ;;  %v2349_v18 = vpack.c.bf16 %v152_v13, %v150_v12  ;;  %v259_v20 = vld [vmem:[#allocation6] sm:$0xff]  ;;  %v2351_v21 = vpack.c.bf16 %v157_v15, %v155_v14  ;;  %vm728_vm10 = vcmask 261126   ;;  %vm730_vm11 = vcmask 523526  }
  0x2b   :  { %2346 = vmatpush1.bf16.msra.mxu1 %v2345_v10  ;;  %v2861_v19 = vpack.c.bf16 %v262_v17, %v260_v16  ;;  %v154_v22 = vld [vmem:[#allocation4 + $0x40] sm:$0xff]  ;;  %v156_v23 = vld [vmem:[#allocation4 + $0x50] sm:$0xff]  ;;  %v159_v27 = vld [vmem:[#allocation4 + $0x68] sm:$0xff]  ;;  %vm617_vm12 = vcmask 259076   ;;  %vm619_vm13 = vcmask 521476   ;;  %vm2796_vm14 = vmmov 0  }
  0x2c   :  { %2348 = vmatprep.subr.bf16.mxu1 %v2347_v11  ;;  %v261_v24 = vld [vmem:[#allocation6 + $0x10] sm:$0xff]  ;;  %v2353_v26 = vpack.c.bf16 %v156_v23, %v154_v22  ;;  %v161_v28 = vld [vmem:[#allocation4 + $0x78] sm:$0xff]  ;;  %v264_v29 = vld [vmem:[#allocation6 + $0x28] sm:$0xff]  ;;  %vm2201_vm15 = vcmask 130048   ;;  %vm2275_vm0 = vcmask 1024  }
  0x2d   :  { %2360 = vmatprep.subr.bf16.mxu0 %v2861_v19  ;;  %v2864_v25 = vpack.c.bf16 %v261_v24, %v259_v20  ;;  %v2355_v30 = vpack.c.bf16 %v161_v28, %v159_v27  ;;  %v266_v31 = vld [vmem:[#allocation6 + $0x38] sm:$0xff]  ;;  %v158_v32 = vld [vmem:[#allocation4 + $0x60] sm:$0xff]  ;;  %v160_v34 = vld [vmem:[#allocation4 + $0x70] sm:$0xff] }
  0x2e   :  { %v2867_v33 = vpack.c.bf16 %v266_v31, %v264_v29  ;;  %v263_v35 = vld [vmem:[#allocation6 + $0x20] sm:$0xff]  ;;  %v265_v36 = vld [vmem:[#allocation6 + $0x30] sm:$0xff]  ;;  %v2357_v37 = vpack.c.bf16 %v160_v34, %v158_v32  ;;  %v268_v39 = vld [vmem:[#allocation6 + $0x48] sm:$0xff] }
  0x2f   :  { %2350 = vmatpush1.bf16.msra.mxu1 %v2349_v18  ;;  %2362 = vmatpush1.bf16.msra.mxu0 %v2864_v25  ;;  %v2869_v38 = vpack.c.bf16 %v265_v36, %v263_v35  ;;  %v270_v40 = vld [vmem:[#allocation6 + $0x58] sm:$0xff]  ;;  %v267_v42 = vld [vmem:[#allocation6 + $0x40] sm:$0xff]  ;;  %v269_v43 = vld [vmem:[#allocation6 + $0x50] sm:$0xff] }
  0x30   :  { %2352 = vmatprep.subr.bf16.mxu1 %v2351_v21  ;;  %2364 = vmatprep.subr.bf16.mxu0 %v2867_v33  ;;  %v2873_v41 = vpack.c.bf16 %v270_v40, %v268_v39  ;;  %v2876_v45 = vpack.c.bf16 %v269_v43, %v267_v42  ;;  %v272_v46 = vld [vmem:[#allocation6 + $0x68] sm:$0xff]  ;;  %v274_v47 = vld [vmem:[#allocation6 + $0x78] sm:$0xff]  ;;  %v271_v49 = vld [vmem:[#allocation6 + $0x60] sm:$0xff] }
  0x31   :  { %v2882_v48 = vpack.c.bf16 %v274_v47, %v272_v46  ;;  %v273_v50 = vld [vmem:[#allocation6 + $0x70] sm:$0xff] }
  0x32   :  { %v2884_v51 = vpack.c.bf16 %v273_v50, %v271_v49  ;;  %v49_v52 = vld [vmem:[%s3362_s4] ss:$0 sm:$0xff]  ;;  %v2283_v63 = vld [vmem:[%s3362_s4 + $0x6] ss:$8 sm:$0x3] }
  0x33   :  { %2354 = vmatpush1.bf16.msra.mxu1 %v2353_v26  ;;  %2366 = vmatpush1.bf16.msra.mxu0 %v2869_v38  ;;  %vm55_vm3 = vcmp.ne.f32.partialorder %v2283_v63, 0.0  ;;  %v2287_v1 = vld [vmem:[%s3362_s4 + $0x1] ss:$8 sm:$0x3]  ;;  %v2972_v46 = vld [vmem:[%s3362_s4 + $0x3] ss:$0 sm:$0xff] }
  0x34   :  { %2356 = vmatprep.subr.bf16.mxu1 %v2355_v30  ;;  %2368 = vmatprep.subr.bf16.mxu0 %v2873_v41  ;;  %v168_v3 = vrot.slane %v2287_v1, %v2917_v0  ;;  %v276_v5 = vsel %vm55_vm3, 1, %v2793_v4  ;;  %v172_v6 = vrot.slane %v2287_v1, %v2922_v2  ;;  %v3207_v13 = vld [vmem:[%s3362_s4 + $0x4] ss:$0 sm:$0xff] }
  0x35   :  { %v280_v8 = vrot.slane %v276_v5, %v2917_v0  ;;  %v284_v11 = vrot.slane %v276_v5, %v2922_v2 }
  0x37   :  { %2358 = vmatpush1.bf16.msra.mxu1 %v2357_v37  ;;  %2370 = vmatpush1.bf16.msra.mxu0 %v2876_v45  ;;  %vm2928_vm4 = vcmp.eq.s32.totalorder %v280_v8, 1  ;;  %vm2932_vm5 = vcmp.eq.s32.totalorder %v284_v11, 1 }
  0x38   :  { %2376 = vmatprep.subr.bf16.mxu1 %v2861_v19  ;;  %2372 = vmatprep.subr.bf16.mxu0 %v2882_v48 }
  0x3b   :  { %2374 = vmatpush1.bf16.msra.mxu0 %v2884_v51 }
  0x3c   :  { %2392 = vmatprep.subr.bf16.mxu0 %v2861_v19 }
  0x3e   :  { %363 = vmatmul.mubr.f32.vlgmr.msra.gmra.mrb[2].mxu0 %v2792_v44 }
  0x3f   :  { %2394 = vmatpush1.bf16.msra.mxu0 %v2864_v25  ;;  %579 = vmatprep.mubr.f32.mxu0 %v2792_v44 }
  0x40   :  { %2396 = vmatprep.subr.bf16.mxu0 %v2867_v33 }
  0x43   :  { %2398 = vmatpush1.bf16.msra.mxu0 %v2869_v38 }
  0x44   :  { %2400 = vmatprep.subr.bf16.mxu0 %v2873_v41 }
  0x47   :  { %2402 = vmatpush1.bf16.msra.mxu0 %v2876_v45 }
  0x48   :  { %2404 = vmatprep.subr.bf16.mxu0 %v2882_v48 }
  0x4b   :  { %2406 = vmatpush1.bf16.msra.mxu0 %v2884_v51 }
  0x4c   :  { %2424 = vmatprep.subr.bf16.mxu0 %v2861_v19 }
  0xfb   :  { %v2335_v53 = vpop.f32.mrb[0].mxu0 }
  0xfc   :  { %v135_v54 = vpop.f32.mrb[1].mxu0  ;;  %v141_v56 = vadd.f32 %v2335_v53, %v49_v52 }
  0xfd   :  { %v136_v55 = vadd.f32 %v135_v54, %v49_v52 }
  0xfe   :  { %v145_v58 = vmax.f32 %v141_v56, 0.0 }
  0xff   :  { %v144_v57 = vmax.f32 %v136_v55, 0.0 }
 0x101   :  { %2288 = vmatmul.mubr.msk.f32.vlgmr.msra.gmra.mrb[0].mxu1 %vm175_vm2, %v144_v57 }
 0x102   :  { %252 = vmatprep.mubr.f32.mxu1 %v2792_v44  ;;  %2378 = vmatpush1.bf16.msra.mxu1 %v2864_v25 }
 0x103   :  { %2380 = vmatprep.subr.bf16.mxu1 %v2867_v33 }
 0x105   :  { %2289 = vmatmul.mubr.msk.f32.gmra.mrb[2].mxu1 %vm175_vm2, %v145_v58 }
 0x106   :  { %2382 = vmatpush1.bf16.msra.mxu1 %v2869_v38  ;;  %468 = vmatprep.mubr.f32.mxu1 %v2792_v44 }
 0x107   :  { %2384 = vmatprep.subr.bf16.mxu1 %v2873_v41 }
 0x10a   :  { %2386 = vmatpush1.bf16.msra.mxu1 %v2876_v45 }
 0x10b   :  { %2388 = vmatprep.subr.bf16.mxu1 %v2882_v48 }
 0x10e   :  { %2390 = vmatpush1.bf16.msra.mxu1 %v2884_v51 }
 0x10f   :  { %2408 = vmatprep.subr.bf16.mxu1 %v2861_v19 }
 0x111   :  { %v364_v59 = vpop.f32.mrb[2].mxu0 }
 0x112   :  { %v366_v60 = vpop.f32.mrb[3].mxu0 }
 0x113   :  { %v376_v47 = vadd.f32 %v366_v60, %v2972_v46 }
 0x1d4   :  { %v248_v7 = vpop.f32.mrb[0].mxu1 }
 0x1d5   :  { %v249_v9 = vadd.f32 %v248_v7, %v168_v3  ;;  %v250_v10 = vpop.f32.mrb[1].mxu1 }
 0x1d6   :  { %v251_v12 = vadd.f32 %v250_v10, %v172_v6 }
 0x1d7   :  { %v734_v18 = vrot.slane %v249_v9, 6  ;;  %v842_v20 = vrot.slane %v249_v9, 2 }
 0x1d8   :  { %v254_v14 = vpop.f32.mrb[2].mxu1  ;;  %v735_v21 = vrot.slane %v251_v12, 6  ;;  %v843_v22 = vrot.slane %v251_v12, 2 }
 0x1d9   :  { %v255_v16 = vadd.f32 %v254_v14, %v168_v3  ;;  %v256_v17 = vpop.f32.mrb[3].mxu1 }
 0x1da   :  { %v257_v23 = vadd.f32 %v256_v17, %v172_v6 }
 0x1db   :  { %v289_v24 = vrot.slane %v255_v16, 6  ;;  %v396_v26 = vrot.slane %v255_v16, 2  ;;  %v2938_v27 = vsel %vm2928_vm4, %v255_v16, %v734_v18  ;;  %v2942_v28 = vsel %vm2928_vm4, %v255_v16, %v842_v20 }
 0x1dc   :  { %v290_v29 = vrot.slane %v257_v23, 6  ;;  %v397_v30 = vrot.slane %v257_v23, 2  ;;  %v2946_v31 = vsel %vm2932_vm5, %v257_v23, %v735_v21  ;;  %v2950_v32 = vsel %vm2932_vm5, %v257_v23, %v843_v22 }
 0x1dd   :  { %v2954_v34 = vsel %vm2928_vm4, %v249_v9, %v289_v24  ;;  %v2958_v35 = vsel %vm2928_vm4, %v249_v9, %v396_v26 }
 0x1de   :  { %v369_v36 = vadd.f32 %v364_v59, %v2954_v34  ;;  %v2963_v37 = vsel %vm2932_vm5, %v251_v12, %v290_v29  ;;  %v2967_v39 = vsel %vm2932_vm5, %v251_v12, %v397_v30 }
 0x1e0   :  { %v2290_v40 = vmul.f32 -1.442695, %v369_v36 }
 0x1e2   :  { %2644 = vpow2.f32 %v2290_v40 }
 0x1ec   :  { %v2645_v42 = vpop.eup %2644 }
 0x1ed   :  { %v373_v43 = vadd.f32 1.0, %v2645_v42 }
 0x1ef   :  { %2646 = vrcp.f32 %v373_v43 }
 0x1f9   :  { %v2647_v49 = vpop.eup %2646 }
 0x1fa   :  { %v377_v50 = vmul.f32 %v2647_v49, %v376_v47  ;;  %v380_v54 = vsub.f32 1.0, %v2647_v49  ;;  %v386_v56 = vmul.f32 0.0, %v2647_v49 }
 0x1fc   :  { %v378_v52 = vadd.f32 %v377_v50, %v2963_v37 }
 0x1fe   :  { %2648 = vtanh.f32 %v378_v52 }
 0x208   :  { %v2649_v53 = vpop.eup %2648 }
 0x209   :  { %382 = vrot.lane.b32.xlu0 %v2649_v53, %s2794_s30 }
 0x27b   :  { %v383_v55 = vpop.permute.xlu0 %382 }
 0x27c   :  { %v385_v57 = vmul.f32 %v383_v55, %v380_v54 }
 0x27e   :  { %v387_v58 = vadd.f32 %v386_v56, %v385_v57 }
 0x280   :  { %389 = vrot.lane.b32.xlu0 %v387_v58, %s2794_s30  ;;  %v498_v6 = vrot.slane %v387_v58, 6 }
 0x2f2   :  { %v390_v59 = vpop.permute.xlu0 %389 }
 0x2f3   :  { %393 = vst.msk [vmem:[#allocation2] sm:$0x3] %vm392_vm6, %v390_v59  ;;  %2291 = vmatmul.mubr.msk.f32.vlgmr.msra.gmra.mrb[4].mxu1 %vm175_vm2, %v390_v59 }
 0x2f4   :  { %395 = vst.msk [vmem:[#allocation2 + $0xe] sm:$0x3] %vm394_vm7, %v390_v59  ;;  %2410 = vmatpush1.bf16.msra.mxu1 %v2864_v25  ;;  %690 = vmatprep.mubr.f32.mxu1 %v2792_v44 }
 0x2f5   :  { %2412 = vmatprep.subr.bf16.mxu1 %v2867_v33 }
 0x2f8   :  { %2414 = vmatpush1.bf16.msra.mxu1 %v2869_v38 }
 0x2f9   :  { %2416 = vmatprep.subr.bf16.mxu1 %v2873_v41 }
 0x2fc   :  { %2418 = vmatpush1.bf16.msra.mxu1 %v2876_v45 }
 0x2fd   :  { %2420 = vmatprep.subr.bf16.mxu1 %v2882_v48 }
 0x300   :  { %2422 = vmatpush1.bf16.msra.mxu1 %v2884_v51 }
 0x301   :  { %2440 = vmatprep.subr.bf16.mxu1 %v2861_v19 }
 0x3c6   :  { %v470_v60 = vpop.f32.mrb[4].mxu1 }
 0x3c7   :  { %v476_v61 = vrot.slane %v470_v60, 6  ;;  %v472_v62 = vpop.f32.mrb[5].mxu1 }
 0x3c8   :  { %v485_v5 = vadd.f32 %v472_v62, %v2972_v46 }
 0x3c9   :  { %v478_v63 = vadd.f32 %v476_v61, %v2958_v35 }
 0x3ca   :  { %v487_v7 = vrot.slane %v485_v5, 6 }
 0x3cb   :  { %v2292_v1 = vmul.f32 -1.442695, %v478_v63 }
 0x3cd   :  { %2650 = vpow2.f32 %v2292_v1 }
 0x3d7   :  { %v2651_v3 = vpop.eup %2650 }
 0x3d8   :  { %v482_v4 = vadd.f32 1.0, %v2651_v3 }
 0x3da   :  { %2652 = vrcp.f32 %v482_v4 }
 0x3e4   :  { %v2653_v8 = vpop.eup %2652 }
 0x3e5   :  { %v489_v9 = vmul.f32 %v2653_v8, %v487_v7  ;;  %v500_v10 = vmul.f32 %v2653_v8, %v498_v6  ;;  %v492_v14 = vsub.f32 1.0, %v2653_v8 }
 0x3e7   :  { %v490_v11 = vadd.f32 %v489_v9, %v2967_v39 }
 0x3e9   :  { %2654 = vtanh.f32 %v490_v11 }
 0x3f3   :  { %v2655_v12 = vpop.eup %2654 }
 0x3f4   :  { %494 = vrot.lane.b32.xlu1 %v2655_v12, %s2794_s30 }
 0x466   :  { %v495_v16 = vpop.permute.xlu1 %494 }
 0x467   :  { %v497_v17 = vmul.f32 %v495_v16, %v492_v14 }
 0x469   :  { %v2994_v18 = vadd.f32 %v500_v10, %v497_v17 }
 0x46b   :  { %v510_v20 = vrot.slane %v2994_v18, 2  ;;  %v609_v53 = vrot.slane %v2994_v18, 6 }
 0x46d   :  { %511 = vrot.lane.b32.xlu1 %v510_v20, %s2794_s30 }
 0x4df   :  { %v512_v21 = vpop.permute.xlu1 %511 }
 0x4e0   :  { %2293 = vmatmul.mubr.msk.f32.vlgmr.msra.gmra.mrb[4].mxu0 %vm175_vm2, %v512_v21 }
 0x4e1   :  { %2426 = vmatpush1.bf16.msra.mxu0 %v2864_v25  ;;  %809 = vmatprep.mubr.f32.mxu0 %v2792_v44 }
 0x4e2   :  { %2428 = vmatprep.subr.bf16.mxu0 %v2867_v33 }
 0x4e5   :  { %2430 = vmatpush1.bf16.msra.mxu0 %v2869_v38 }
 0x4e6   :  { %2432 = vmatprep.subr.bf16.mxu0 %v2873_v41 }
 0x4e9   :  { %2434 = vmatpush1.bf16.msra.mxu0 %v2876_v45 }
 0x4ea   :  { %2436 = vmatprep.subr.bf16.mxu0 %v2882_v48 }
 0x4ed   :  { %2438 = vmatpush1.bf16.msra.mxu0 %v2884_v51 }
 0x4ee   :  { %2456 = vmatprep.subr.bf16.mxu0 %v2861_v19 }
 0x5b3   :  { %v581_v22 = vpop.f32.mrb[4].mxu0 }
 0x5b4   :  { %v587_v23 = vrot.slane %v581_v22, 4  ;;  %v583_v24 = vpop.f32.mrb[5].mxu0 }
 0x5b5   :  { %v596_v40 = vadd.f32 %v583_v24, %v2972_v46 }
 0x5b6   :  { %v589_v26 = vadd.f32 %v587_v23, %v2954_v34 }
 0x5b7   :  { %v598_v42 = vrot.slane %v596_v40, 4 }
 0x5b8   :  { %v2294_v29 = vmul.f32 -1.442695, %v589_v26 }
 0x5ba   :  { %2656 = vpow2.f32 %v2294_v29 }
 0x5c4   :  { %v2657_v30 = vpop.eup %2656 }
 0x5c5   :  { %v593_v36 = vadd.f32 1.0, %v2657_v30 }
 0x5c7   :  { %2658 = vrcp.f32 %v593_v36 }
 0x5d1   :  { %v2659_v43 = vpop.eup %2658 }
 0x5d2   :  { %v600_v47 = vmul.f32 %v2659_v43, %v598_v42  ;;  %v603_v52 = vsub.f32 1.0, %v2659_v43  ;;  %v611_v54 = vmul.f32 %v2659_v43, %v609_v53 }
 0x5d4   :  { %v601_v49 = vadd.f32 %v600_v47, %v2963_v37 }
 0x5d6   :  { %2660 = vtanh.f32 %v601_v49 }
 0x5e0   :  { %v2661_v50 = vpop.eup %2660 }
 0x5e1   :  { %605 = vrot.lane.b32.xlu0 %v2661_v50, %s2794_s30 }
 0x653   :  { %v606_v34 = vpop.permute.xlu0 %605 }
 0x654   :  { %v608_v55 = vmul.f32 %v606_v34, %v603_v52 }
 0x656   :  { %v3013_v56 = vadd.f32 %v611_v54, %v608_v55 }
 0x658   :  { %v621_v57 = vrot.slane %v3013_v56, 4  ;;  %v720_v9 = vrot.slane %v3013_v56, 6 }
 0x65a   :  { %622 = vrot.lane.b32.xlu1 %v621_v57, %s2794_s30 }
 0x6cc   :  { %v623_v58 = vpop.permute.xlu1 %622 }
 0x6cd   :  { %2295 = vmatmul.mubr.msk.f32.vlgmr.msra.gmra.mrb[6].mxu1 %vm175_vm2, %v623_v58 }
 0x6ce   :  { %2442 = vmatpush1.bf16.msra.mxu1 %v2864_v25  ;;  %914 = vmatprep.mubr.f32.mxu1 %v2792_v44 }
 0x6cf   :  { %2444 = vmatprep.subr.bf16.mxu1 %v2867_v33 }
 0x6d2   :  { %2446 = vmatpush1.bf16.msra.mxu1 %v2869_v38 }
 0x6d3   :  { %2448 = vmatprep.subr.bf16.mxu1 %v2873_v41 }
 0x6d6   :  { %2450 = vmatpush1.bf16.msra.mxu1 %v2876_v45 }
 0x6d7   :  { %2452 = vmatprep.subr.bf16.mxu1 %v2882_v48 }
 0x6da   :  { %2454 = vmatpush1.bf16.msra.mxu1 %v2884_v51 }
 0x6db   :  { %2472 = vmatprep.subr.bf16.mxu1 %v2861_v19 }
 0x7a0   :  { %v692_v37 = vpop.f32.mrb[6].mxu1 }
 0x7a1   :  { %v698_v59 = vrot.slane %v692_v37, 2  ;;  %v694_v60 = vpop.f32.mrb[7].mxu1 }
 0x7a2   :  { %v707_v3 = vadd.f32 %v694_v60, %v2972_v46 }
 0x7a3   :  { %v700_v61 = vadd.f32 %v698_v59, %v2958_v35 }
 0x7a4   :  { %v709_v4 = vrot.slane %v707_v3, 2 }
 0x7a5   :  { %v2296_v62 = vmul.f32 -1.442695, %v700_v61 }
 0x7a7   :  { %2662 = vpow2.f32 %v2296_v62 }
 0x7b1   :  { %v2663_v63 = vpop.eup %2662 }
 0x7b2   :  { %v704_v1 = vadd.f32 1.0, %v2663_v63 }
 0x7b4   :  { %2664 = vrcp.f32 %v704_v1 }
 0x7be   :  { %v2665_v5 = vpop.eup %2664 }
 0x7bf   :  { %v711_v6 = vmul.f32 %v2665_v5, %v709_v4  ;;  %v714_v19 = vsub.f32 1.0, %v2665_v5  ;;  %v722_v10 = vmul.f32 %v2665_v5, %v720_v9 }
 0x7c1   :  { %v712_v7 = vadd.f32 %v711_v6, %v2967_v39 }
 0x7c3   :  { %2666 = vtanh.f32 %v712_v7 }
 0x7cd   :  { %v2667_v8 = vpop.eup %2666 }
 0x7ce   :  { %716 = vrot.lane.b32.xlu0 %v2667_v8, %s2794_s30 }
 0x840   :  { %v717_v35 = vpop.permute.xlu0 %716 }
 0x841   :  { %v719_v11 = vmul.f32 %v717_v35, %v714_v19 }
 0x843   :  { %v3032_v12 = vadd.f32 %v722_v10, %v719_v11 }
 0x845   :  { %v740_v14 = vrot.slane %v3032_v12, 6 }
 0x847   :  { %741 = vrot.lane.b32.xlu1 %v740_v14, %s2794_s30 }
 0x8b9   :  { %v742_v16 = vpop.permute.xlu1 %741 }
 0x8ba   :  { %2297 = vmatmul.mubr.msk.f32.vlgmr.msra.gmra.mrb[6].mxu0 %vm175_vm2, %v742_v16 }
 0x8bb   :  { %2458 = vmatpush1.bf16.msra.mxu0 %v2864_v25  ;;  %1023 = vmatprep.mubr.f32.mxu0 %v2792_v44 }
 0x8bc   :  { %2460 = vmatprep.subr.bf16.mxu0 %v2867_v33 }
 0x8bf   :  { %2462 = vmatpush1.bf16.msra.mxu0 %v2869_v38 }
 0x8c0   :  { %2464 = vmatprep.subr.bf16.mxu0 %v2873_v41 }
 0x8c3   :  { %2466 = vmatpush1.bf16.msra.mxu0 %v2876_v45 }
 0x8c4   :  { %2468 = vmatprep.subr.bf16.mxu0 %v2882_v48 }
 0x8c7   :  { %2470 = vmatpush1.bf16.msra.mxu0 %v2884_v51 }
 0x98d   :  { %v811_v39 = vpop.f32.mrb[6].mxu0 }
 0x98e   :  { %v816_v17 = vadd.f32 %v811_v39, %v2938_v27  ;;  %v813_v20 = vpop.f32.mrb[7].mxu0 }
 0x98f   :  { %v823_v24 = vadd.f32 %v813_v20, %v2972_v46 }
 0x990   :  { %v2298_v21 = vmul.f32 -1.442695, %v816_v17 }
 0x992   :  { %2668 = vpow2.f32 %v2298_v21 }
 0x99c   :  { %v2669_v22 = vpop.eup %2668 }
 0x99d   :  { %v820_v23 = vadd.f32 1.0, %v2669_v22 }
 0x99f   :  { %2670 = vrcp.f32 %v820_v23 }
 0x9a9   :  { %v2671_v26 = vpop.eup %2670 }
 0x9aa   :  { %v824_v29 = vmul.f32 %v2671_v26, %v823_v24  ;;  %v827_v40 = vsub.f32 1.0, %v2671_v26  ;;  %v834_v43 = vmul.f32 %v2671_v26, %v740_v14 }
 0x9ac   :  { %v825_v30 = vadd.f32 %v824_v29, %v2946_v31 }
 0x9ae   :  { %2672 = vtanh.f32 %v825_v30 }
 0x9b8   :  { %v2673_v36 = vpop.eup %2672 }
 0x9b9   :  { %829 = vrot.lane.b32.xlu0 %v2673_v36, %s2794_s30 }
 0xa2b   :  { %v830_v42 = vpop.permute.xlu0 %829 }
 0xa2c   :  { %v832_v47 = vmul.f32 %v830_v42, %v827_v40 }
 0xa2e   :  { %v835_v49 = vadd.f32 %v834_v43, %v832_v47 }
 0xa30   :  { %837 = vrot.lane.b32.xlu1 %v835_v49, %s2794_s30 }
 0xaa2   :  { %v3050_v50 = vpop.permute.xlu1 %837 }
 0xaa3   :  { %2299 = vmatmul.mubr.msk.f32.vlgmr.msra.gmra.mrb[8].mxu1 %vm175_vm2, %v3050_v50 }
 0xaa4   :  { %2474 = vmatpush1.bf16.msra.mxu1 %v2864_v25  ;;  %1132 = vmatprep.mubr.f32.mxu1 %v2792_v44 }
 0xaa5   :  { %2476 = vmatprep.subr.bf16.mxu1 %v2867_v33 }
 0xaa8   :  { %2478 = vmatpush1.bf16.msra.mxu1 %v2869_v38  ;;  %v944_v38 = vrot.slane %v835_v49, 6 }
 0xaa9   :  { %2480 = vmatprep.subr.bf16.mxu1 %v2873_v41 }
 0xaac   :  { %2482 = vmatpush1.bf16.msra.mxu1 %v2876_v45 }
 0xaad   :  { %2484 = vmatprep.subr.bf16.mxu1 %v2882_v48 }
 0xab0   :  { %2486 = vmatpush1.bf16.msra.mxu1 %v2884_v51 }
 0xb76   :  { %v916_v52 = vpop.f32.mrb[8].mxu1 }
 0xb77   :  { %v922_v53 = vrot.slane %v916_v52, 6  ;;  %v918_v34 = vpop.f32.mrb[9].mxu1 }
 0xb78   :  { %v931_v33 = vadd.f32 %v918_v34, %v2972_v46 }
 0xb79   :  { %v924_v54 = vadd.f32 %v922_v53, %v2942_v28 }
 0xb7a   :  { %v933_v41 = vrot.slane %v931_v33, 6  ;;  %v1177_v33 = vld [vmem:[#allocation4 + $0x90] sm:$0xff] }
 0xb7b   :  { %v2300_v25 = vmul.f32 -1.442695, %v924_v54 }
 0xb7d   :  { %2674 = vpow2.f32 %v2300_v25  ;;  %v1178_v25 = vld [vmem:[#allocation4 + $0x98] sm:$0xff] }
 0xb87   :  { %v2675_v55 = vpop.eup %2674 }
 0xb88   :  { %v928_v57 = vadd.f32 1.0, %v2675_v55  ;;  %v1175_v55 = vld [vmem:[#allocation4 + $0x80] sm:$0xff] }
 0xb8a   :  { %2676 = vrcp.f32 %v928_v57 }
 0xb94   :  { %v2677_v58 = vpop.eup %2676 }
 0xb95   :  { %v935_v45 = vmul.f32 %v2677_v58, %v933_v41  ;;  %v946_v37 = vmul.f32 %v2677_v58, %v944_v38  ;;  %v938_v59 = vsub.f32 1.0, %v2677_v58  ;;  %v1180_v38 = vld [vmem:[#allocation4 + $0xa8] sm:$0xff]  ;;  %v1182_v41 = vld [vmem:[#allocation4 + $0xb8] sm:$0xff] }
 0xb96   :  { %v2491_v58 = vpack.c.bf16 %v1182_v41, %v1180_v38 }
 0xb97   :  { %v936_v48 = vadd.f32 %v935_v45, %v2950_v32  ;;  %v1179_v45 = vld [vmem:[#allocation4 + $0xa0] sm:$0xff] }
 0xb99   :  { %2678 = vtanh.f32 %v936_v48 }
 0xba3   :  { %v2679_v51 = vpop.eup %2678 }
 0xba4   :  { %940 = vrot.lane.b32.xlu0 %v2679_v51, %s2794_s30 }
 0xc16   :  { %v941_v60 = vpop.permute.xlu0 %940 }
 0xc17   :  { %v943_v61 = vmul.f32 %v941_v60, %v938_v59  ;;  %v1186_v59 = vld [vmem:[#allocation4 + $0xd8] sm:$0xff]  ;;  %v1289_v60 = vld [vmem:[#allocation6 + $0x88] sm:$0xff] }
 0xc19   :  { %v3066_v62 = vadd.f32 %v946_v37, %v943_v61  ;;  %v1181_v37 = vld [vmem:[#allocation4 + $0xb0] sm:$0xff] }
 0xc1a   :  { %v2493_v51 = vpack.c.bf16 %v1181_v37, %v1179_v45 }
 0xc1b   :  { %v954_v63 = vrot.slane %v3066_v62, 2  ;;  %v1053_v17 = vrot.slane %v3066_v62, 6 }
 0xc1d   :  { %955 = vrot.lane.b32.xlu1 %v954_v63, %s2794_s30  ;;  %v1291_v63 = vld [vmem:[#allocation6 + $0x98] sm:$0xff] }
 0xc8f   :  { %v956_v1 = vpop.permute.xlu1 %955 }
 0xc90   :  { %2301 = vmatmul.mubr.msk.f32.vlgmr.msra.gmra.mrb[8].mxu0 %vm175_vm2, %v956_v1  ;;  %v1183_v1 = vld [vmem:[#allocation4 + $0xc0] sm:$0xff] }
 0xc91   :  { %1274 = vmatprep.mubr.f32.mxu0 %v2792_v44 }
 0xd63   :  { %v1025_v3 = vpop.f32.mrb[8].mxu0 }
 0xd64   :  { %v1031_v4 = vrot.slane %v1025_v3, 4  ;;  %v1027_v5 = vpop.f32.mrb[9].mxu0  ;;  %v1185_v3 = vld [vmem:[#allocation4 + $0xd0] sm:$0xff] }
 0xd65   :  { %v1040_v9 = vadd.f32 %v1027_v5, %v2972_v46  ;;  %v2497_v5 = vpack.c.bf16 %v1185_v3, %v1183_v1 }
 0xd66   :  { %v1033_v6 = vadd.f32 %v1031_v4, %v2938_v27  ;;  %v3109_v4 = vpack.c.bf16 %v1291_v63, %v1289_v60 }
 0xd67   :  { %v1042_v35 = vrot.slane %v1040_v9, 4  ;;  %v1293_v9 = vld [vmem:[#allocation6 + $0xa8] sm:$0xff] }
 0xd68   :  { %v2302_v7 = vmul.f32 -1.442695, %v1033_v6  ;;  %v1288_v6 = vld [vmem:[#allocation6 + $0x80] sm:$0xff]  ;;  %2504 = vmatprep.subr.bf16.mxu1 %v3109_v4 }
 0xd6a   :  { %2680 = vpow2.f32 %v2302_v7  ;;  %v1290_v7 = vld [vmem:[#allocation6 + $0x90] sm:$0xff] }
 0xd74   :  { %v2681_v8 = vpop.eup %2680 }
 0xd75   :  { %v1037_v19 = vadd.f32 1.0, %v2681_v8  ;;  %v3111_v8 = vpack.c.bf16 %v1290_v7, %v1288_v6 }
 0xd77   :  { %2682 = vrcp.f32 %v1037_v19  ;;  %v1188_v19 = vld [vmem:[#allocation4 + $0xe8] sm:$0xff] }
 0xd81   :  { %v2683_v10 = vpop.eup %2682 }
 0xd82   :  { %v1044_v11 = vmul.f32 %v2683_v10, %v1042_v35  ;;  %v1047_v39 = vsub.f32 1.0, %v2683_v10  ;;  %v1055_v20 = vmul.f32 %v2683_v10, %v1053_v17  ;;  %v1295_v35 = vld [vmem:[#allocation6 + $0xb8] sm:$0xff]  ;;  %v1187_v10 = vld [vmem:[#allocation4 + $0xe0] sm:$0xff]  ;;  %v1294_v17 = vld [vmem:[#allocation6 + $0xb0] sm:$0xff] }
 0xd84   :  { %v1045_v14 = vadd.f32 %v1044_v11, %v2946_v31  ;;  %v1189_v11 = vld [vmem:[#allocation4 + $0xf0] sm:$0xff] }
 0xd86   :  { %2684 = vtanh.f32 %v1045_v14  ;;  %v3115_v14 = vpack.c.bf16 %v1295_v35, %v1293_v9 }
 0xd90   :  { %v2685_v16 = vpop.eup %2684 }
 0xd91   :  { %1049 = vrot.lane.b32.xlu0 %v2685_v16, %s2794_s30  ;;  %v2501_v16 = vpack.c.bf16 %v1189_v11, %v1187_v10 }
 0xe03   :  { %v1050_v27 = vpop.permute.xlu0 %1049 }
 0xe04   :  { %v1052_v21 = vmul.f32 %v1050_v27, %v1047_v39  ;;  %v1292_v39 = vld [vmem:[#allocation6 + $0xa0] sm:$0xff] }
 0xe05   :  { %v3117_v27 = vpack.c.bf16 %v1294_v17, %v1292_v39 }
 0xe06   :  { %v1056_v22 = vadd.f32 %v1055_v20, %v1052_v21  ;;  %v1297_v20 = vld [vmem:[#allocation6 + $0xc8] sm:$0xff]  ;;  %v1299_v21 = vld [vmem:[#allocation6 + $0xd8] sm:$0xff] }
 0xe08   :  { %v1063_v23 = vrot.slane %v1056_v22, 4 }
 0xe0a   :  { %1064 = vrot.lane.b32.xlu1 %v1063_v23, %s2794_s30  ;;  %v1296_v23 = vld [vmem:[#allocation6 + $0xc0] sm:$0xff] }
 0xe0e   :  { %503 = vrot.lane.b32.xlu1 %v2994_v18, %s2794_s30 }
 0xe12   :  { %725 = vrot.lane.b32.xlu1 %v3032_v12, %s2794_s30 }
 0xe16   :  { %1058 = vrot.lane.b32.xlu1 %v1056_v22, %s2794_s30 }
 0xe7c   :  { %v1065_v31 = vpop.permute.xlu1 %1064 }
 0xe7d   :  { %2303 = vmatmul.mubr.msk.f32.vlgmr.msra.gmra.mrb[10].mxu1 %vm175_vm2, %v1065_v31  ;;  %v1298_v31 = vld [vmem:[#allocation6 + $0xd0] sm:$0xff] }
 0xe7e   :  { %1377 = vmatprep.mubr.f32.mxu1 %v2792_v44  ;;  %2506 = vmatpush1.bf16.msra.mxu1 %v3111_v8 }
 0xe7f   :  { %2508 = vmatprep.subr.bf16.mxu1 %v3115_v14 }
 0xe80   :  { %v504_v24 = vpop.permute.xlu1 %503 }
 0xe81   :  { %507 = vst.msk [vmem:[#allocation2] sm:$0xc] %vm506_vm8, %v504_v24 }
 0xe82   :  { %509 = vst.msk [vmem:[#allocation2 + $0xa] sm:$0xc] %vm508_vm9, %v504_v24  ;;  %2510 = vmatpush1.bf16.msra.mxu1 %v3117_v27 }
 0xe84   :  { %v726_v18 = vpop.permute.xlu1 %725 }
 0xe85   :  { %729 = vst.msk [vmem:[#allocation2] sm:$0xc0] %vm728_vm10, %v726_v18 }
 0xe86   :  { %731 = vst.msk [vmem:[#allocation2 + $0x2] sm:$0xc0] %vm730_vm11, %v726_v18  ;;  %v3125_v18 = vpack.c.bf16 %v1298_v31, %v1296_v23 }
 0xe87   :  { %840 = vst.msk [vmem:[#allocation2 + $0x8] sm:$0x3] %vm392_vm6, %v3050_v50 }
 0xe88   :  { %841 = vst.msk [vmem:[#allocation2 + $0x6] sm:$0x3] %vm394_vm7, %v3050_v50  ;;  %v1059_v12 = vpop.permute.xlu1 %1058  ;;  %v1162_v50 = vrot.slane %v1056_v22, 6  ;;  %v3121_v22 = vpack.c.bf16 %v1299_v21, %v1297_v20 }
 0xe89   :  { %1061 = vst.msk [vmem:[#allocation2 + $0x8] sm:$0x30] %vm617_vm12, %v1059_v12 }
 0xe8a   :  { %1062 = vst.msk [vmem:[#allocation2 - $0x2] sm:$0x30] %vm619_vm13, %v1059_v12  ;;  %2512 = vmatprep.subr.bf16.mxu1 %v3121_v22 }
 0xe8b   :  { %2514 = vmatpush1.bf16.msra.mxu1 %v3125_v18 }
 0xf50   :  { %v1134_v26 = vpop.f32.mrb[10].mxu1 }
 0xf51   :  { %v1140_v29 = vrot.slane %v1134_v26, 2  ;;  %v1136_v30 = vpop.f32.mrb[11].mxu1 }
 0xf52   :  { %v1149_v47 = vadd.f32 %v1136_v30, %v2972_v46  ;;  %v2489_v46 = vpack.c.bf16 %v1177_v33, %v1175_v55  ;;  %v1303_v30 = vld [vmem:[#allocation6 + $0xf8] sm:$0xff] }
 0xf53   :  { %v1142_v36 = vadd.f32 %v1140_v29, %v2942_v28  ;;  %v1176_v28 = vld [vmem:[#allocation4 + $0x88] sm:$0xff] }
 0xf54   :  { %v1151_v49 = vrot.slane %v1149_v47, 2  ;;  %v2487_v57 = vpack.c.bf16 %v1178_v25, %v1176_v28  ;;  %v1301_v29 = vld [vmem:[#allocation6 + $0xe8] sm:$0xff]  ;;  %v2305_v25 = vld [vmem:[%s3362_s4 + $0x2] ss:$8 sm:$0x3] }
 0xf55   :  { %v2304_v40 = vmul.f32 -1.442695, %v1142_v36  ;;  %v3129_v36 = vpack.c.bf16 %v1303_v30, %v1301_v29  ;;  %v1197_v55 = vrot.slane %v2305_v25, %v2917_v0 }
 0xf56   :  { %2488 = vmatprep.subr.bf16.mxu0 %v2487_v57  ;;  %v1201_v57 = vrot.slane %v2305_v25, %v2922_v2 }
 0xf57   :  { %2686 = vpow2.f32 %v2304_v40  ;;  %2490 = vmatpush1.bf16.msra.mxu0 %v2489_v46  ;;  %v1300_v40 = vld [vmem:[#allocation6 + $0xe0] sm:$0xff]  ;;  %2516 = vmatprep.subr.bf16.mxu1 %v3129_v36 }
 0xf58   :  { %2492 = vmatprep.subr.bf16.mxu0 %v2491_v58 }
 0xf5b   :  { %2494 = vmatpush1.bf16.msra.mxu0 %v2493_v51 }
 0xf61   :  { %v2687_v42 = vpop.eup %2686 }
 0xf62   :  { %v1146_v43 = vadd.f32 1.0, %v2687_v42  ;;  %v1302_v42 = vld [vmem:[#allocation6 + $0xf0] sm:$0xff] }
 0xf63   :  { %v3132_v47 = vpack.c.bf16 %v1302_v42, %v1300_v40 }
 0xf64   :  { %2688 = vrcp.f32 %v1146_v43 }
 0xf65   :  { %2518 = vmatpush1.bf16.msra.mxu1 %v3132_v47 }
 0xf66   :  { %2536 = vmatprep.subr.bf16.mxu1 %v3109_v4 }
 0xf68   :  { %1378 = vmatmul.mubr.f32.vlgmr.msra.gmra.mrb[12].mxu1 %v2792_v44 }
 0xf69   :  { %2538 = vmatpush1.bf16.msra.mxu1 %v3111_v8  ;;  %1590 = vmatprep.mubr.f32.mxu1 %v2792_v44 }
 0xf6a   :  { %2540 = vmatprep.subr.bf16.mxu1 %v3115_v14 }
 0xf6d   :  { %2542 = vmatpush1.bf16.msra.mxu1 %v3117_v27 }
 0xf6e   :  { %v3097_v52 = vpop.eup %2688  ;;  %2544 = vmatprep.subr.bf16.mxu1 %v3121_v22 }
 0xf6f   :  { %v1153_v53 = vmul.f32 %v3097_v52, %v1151_v49  ;;  %v3101_v34 = vmul.f32 %v3097_v52, %v1162_v50  ;;  %v1156_v24 = vsub.f32 1.0, %v3097_v52 }
 0xf71   :  { %v1154_v54 = vadd.f32 %v1153_v53, %v2950_v32  ;;  %v1184_v32 = vld [vmem:[#allocation4 + $0xc8] sm:$0xff]  ;;  %2546 = vmatpush1.bf16.msra.mxu1 %v3125_v18 }
 0xf72   :  { %v2495_v61 = vpack.c.bf16 %v1186_v59, %v1184_v32  ;;  %2548 = vmatprep.subr.bf16.mxu1 %v3129_v36 }
 0xf73   :  { %2690 = vtanh.f32 %v1154_v54 }
 0xf74   :  { %2496 = vmatprep.subr.bf16.mxu0 %v2495_v61 }
 0xf75   :  { %2498 = vmatpush1.bf16.msra.mxu0 %v2497_v5  ;;  %2550 = vmatpush1.bf16.msra.mxu1 %v3132_v47 }
 0xf76   :  { %2568 = vmatprep.subr.bf16.mxu1 %v3109_v4 }
 0xf7d   :  { %v2691_v48 = vpop.eup %2690 }
 0xf7e   :  { %1158 = vrot.lane.b32.xlu0 %v2691_v48, %s2794_s30 }
 0xf82   :  { %614 = vrot.lane.b32.xlu0 %v3013_v56, %s2794_s30  ;;  %v1190_v56 = vld [vmem:[#allocation4 + $0xf8] sm:$0xff] }
 0xf86   :  { %949 = vrot.lane.b32.xlu0 %v3066_v62, %s2794_s30  ;;  %v2499_v62 = vpack.c.bf16 %v1190_v56, %v1188_v19 }
 0xf88   :  { %2500 = vmatprep.subr.bf16.mxu0 %v2499_v62 }
 0xf89   :  { %2502 = vmatpush1.bf16.msra.mxu0 %v2501_v16 }
 0xf8a   :  { %2520 = vmatprep.subr.bf16.mxu0 %v3109_v4 }
 0xff0   :  { %v1159_v12 = vpop.permute.xlu0 %1158 }
 0xff1   :  { %v1161_v26 = vmul.f32 %v1159_v12, %v1156_v24 }
 0xff3   :  { %v1165_v43 = vadd.f32 %v3101_v34, %v1161_v26 }
 0xff4   :  { %v615_v49 = vpop.permute.xlu0 %614 }
 0xff5   :  { %618 = vst.msk [vmem:[#allocation2] sm:$0x30] %vm617_vm12, %v615_v49  ;;  %1167 = vrot.lane.b32.xlu0 %v1165_v43, %s2794_s30 }
 0xff6   :  { %620 = vst.msk [vmem:[#allocation2 + $0x6] sm:$0x30] %vm619_vm13, %v615_v49 }
 0xff8   :  { %v950_v50 = vpop.permute.xlu0 %949 }
 0xff9   :  { %952 = vst.msk [vmem:[#allocation2 + $0x8] sm:$0xc] %vm506_vm8, %v950_v50 }
 0xffa   :  { %953 = vst.msk [vmem:[#allocation2 + $0x2] sm:$0xc] %vm508_vm9, %v950_v50 }
0x103b   :  { %v1379_v54 = vpop.f32.mrb[12].mxu1 }
0x103c   :  { %v1381_v28 = vpop.f32.mrb[13].mxu1 }
0x103d   :  { %v1391_v16 = vadd.f32 %v1381_v28, %v3207_v13 }
0x1067   :  { %v1168_v52 = vpop.permute.xlu0 %1167 }
0x1068   :  { %1170 = vst.msk [vmem:[#allocation2 + $0x8] sm:$0xc0] %vm728_vm10, %v1168_v52 }
0x1069   :  { %1171 = vst.msk [vmem:[#allocation2 - $0x6] sm:$0xc0] %vm730_vm11, %v1168_v52 }
0x106f   :  { %v1173_v34 = vld [vmem:[#allocation2 + $0x8] sm:$0xff] }
0x1070   :  { %v1172_v53 = vld [vmem:[#allocation2] sm:$0xff] }
0x1071   :  { %2306 = vmatmul.mubr.msk.f32.vlgmr.msra.gmra.mrb[10].mxu0 %vm175_vm2, %v1172_v53 }
0x1072   :  { %1280 = vmatprep.mubr.f32.mxu0 %v2792_v44  ;;  %2522 = vmatpush1.bf16.msra.mxu0 %v3111_v8 }
0x1073   :  { %2524 = vmatprep.subr.bf16.mxu0 %v3115_v14 }
0x1075   :  { %2307 = vmatmul.mubr.msk.f32.gmra.mrb[12].mxu0 %vm175_vm2, %v1173_v34 }
0x1076   :  { %2526 = vmatpush1.bf16.msra.mxu0 %v3117_v27  ;;  %1481 = vmatprep.mubr.f32.mxu0 %v2792_v44 }
0x1077   :  { %2528 = vmatprep.subr.bf16.mxu0 %v3121_v22 }
0x107a   :  { %2530 = vmatpush1.bf16.msra.mxu0 %v3125_v18 }
0x107b   :  { %2532 = vmatprep.subr.bf16.mxu0 %v3129_v36 }
0x107e   :  { %2534 = vmatpush1.bf16.msra.mxu0 %v3132_v47 }
0x107f   :  { %2552 = vmatprep.subr.bf16.mxu0 %v3109_v4 }
0x1144   :  { %v1276_v33 = vpop.f32.mrb[10].mxu0 }
0x1145   :  { %v1277_v38 = vadd.f32 %v1276_v33, %v1197_v55  ;;  %v1278_v41 = vpop.f32.mrb[11].mxu0 }
0x1146   :  { %v1279_v46 = vadd.f32 %v1278_v41, %v1201_v57 }
0x1147   :  { %v1741_v48 = vrot.slane %v1277_v38, 6  ;;  %v1849_v51 = vrot.slane %v1277_v38, 2 }
0x1148   :  { %v1282_v58 = vpop.f32.mrb[12].mxu0  ;;  %v1742_v32 = vrot.slane %v1279_v46, 6  ;;  %v1850_v59 = vrot.slane %v1279_v46, 2 }
0x1149   :  { %v1283_v45 = vadd.f32 %v1282_v58, %v1197_v55  ;;  %v1284_v37 = vpop.f32.mrb[13].mxu0 }
0x114a   :  { %v1285_v60 = vadd.f32 %v1284_v37, %v1201_v57 }
0x114b   :  { %v1307_v61 = vrot.slane %v1283_v45, 6  ;;  %v1409_v63 = vrot.slane %v1283_v45, 2  ;;  %v3173_v1 = vsel %vm2928_vm4, %v1283_v45, %v1741_v48  ;;  %v3177_v0 = vsel %vm2928_vm4, %v1283_v45, %v1849_v51 }
0x114c   :  { %v1308_v2 = vrot.slane %v1285_v60, 6  ;;  %v1410_v3 = vrot.slane %v1285_v60, 2  ;;  %v3181_v5 = vsel %vm2932_vm5, %v1285_v60, %v1742_v32  ;;  %v3185_v6 = vsel %vm2932_vm5, %v1285_v60, %v1850_v59 }
0x114d   :  { %v3189_v7 = vsel %vm2928_vm4, %v1277_v38, %v1307_v61  ;;  %v3193_v19 = vsel %vm2928_vm4, %v1277_v38, %v1409_v63 }
0x114e   :  { %v1384_v56 = vadd.f32 %v1379_v54, %v3189_v7  ;;  %v3198_v9 = vsel %vm2932_vm5, %v1279_v46, %v1308_v2  ;;  %v3202_v62 = vsel %vm2932_vm5, %v1279_v46, %v1410_v3 }
0x1150   :  { %v2308_v35 = vmul.f32 -1.442695, %v1384_v56 }
0x1152   :  { %2692 = vpow2.f32 %v2308_v35 }
0x115c   :  { %v2693_v10 = vpop.eup %2692 }
0x115d   :  { %v1388_v11 = vadd.f32 1.0, %v2693_v10 }
0x115f   :  { %2694 = vrcp.f32 %v1388_v11 }
0x1169   :  { %v2695_v39 = vpop.eup %2694 }
0x116a   :  { %v1392_v17 = vmul.f32 %v2695_v39, %v1391_v16  ;;  %v1395_v21 = vsub.f32 1.0, %v2695_v39  ;;  %v1401_v31 = vmul.f32 0.0, %v2695_v39 }
0x116c   :  { %v1393_v20 = vadd.f32 %v1392_v17, %v3198_v9 }
0x116e   :  { %2696 = vtanh.f32 %v1393_v20 }
0x1178   :  { %v2697_v15 = vpop.eup %2696 }
0x1179   :  { %1397 = vrot.lane.b32.xlu1 %v2697_v15, %s2794_s30 }
0x11eb   :  { %v1398_v23 = vpop.permute.xlu1 %1397 }
0x11ec   :  { %v1400_v24 = vmul.f32 %v1398_v23, %v1395_v21 }
0x11ee   :  { %v1402_v12 = vadd.f32 %v1401_v31, %v1400_v24 }
0x11f0   :  { %1404 = vrot.lane.b32.xlu0 %v1402_v12, %s2794_s30  ;;  %v1511_v53 = vrot.slane %v1402_v12, 6 }
0x1262   :  { %v1405_v26 = vpop.permute.xlu0 %1404 }
0x1263   :  { %1407 = vst.msk [vmem:[#allocation3] sm:$0x3] %vm392_vm6, %v1405_v26  ;;  %2309 = vmatmul.mubr.msk.f32.vlgmr.msra.gmra.mrb[14].mxu0 %vm175_vm2, %v1405_v26 }
0x1264   :  { %1408 = vst.msk [vmem:[#allocation3 + $0xe] sm:$0x3] %vm394_vm7, %v1405_v26  ;;  %2554 = vmatpush1.bf16.msra.mxu0 %v3111_v8  ;;  %1699 = vmatprep.mubr.f32.mxu0 %v2792_v44 }
0x1265   :  { %2556 = vmatprep.subr.bf16.mxu0 %v3115_v14 }
0x1268   :  { %2558 = vmatpush1.bf16.msra.mxu0 %v3117_v27 }
0x1269   :  { %2560 = vmatprep.subr.bf16.mxu0 %v3121_v22 }
0x126c   :  { %2562 = vmatpush1.bf16.msra.mxu0 %v3125_v18 }
0x126d   :  { %2564 = vmatprep.subr.bf16.mxu0 %v3129_v36 }
0x1270   :  { %2566 = vmatpush1.bf16.msra.mxu0 %v3132_v47 }
0x1271   :  { %2584 = vmatprep.subr.bf16.mxu0 %v3109_v4 }
0x1336   :  { %v1483_v29 = vpop.f32.mrb[14].mxu0 }
0x1337   :  { %v1489_v30 = vrot.slane %v1483_v29, 6  ;;  %v1485_v40 = vpop.f32.mrb[15].mxu0 }
0x1338   :  { %v1498_v52 = vadd.f32 %v1485_v40, %v3207_v13 }
0x1339   :  { %v1491_v42 = vadd.f32 %v1489_v30, %v3193_v19 }
0x133a   :  { %v1500_v34 = vrot.slane %v1498_v52, 6 }
0x133b   :  { %v2310_v43 = vmul.f32 -1.442695, %v1491_v42 }
0x133d   :  { %2698 = vpow2.f32 %v2310_v43 }
0x1347   :  { %v2699_v49 = vpop.eup %2698 }
0x1348   :  { %v1495_v50 = vadd.f32 1.0, %v2699_v49 }
0x134a   :  { %2700 = vrcp.f32 %v1495_v50 }
0x1354   :  { %v2701_v54 = vpop.eup %2700 }
0x1355   :  { %v1502_v28 = vmul.f32 %v2701_v54, %v1500_v34  ;;  %v1513_v25 = vmul.f32 %v2701_v54, %v1511_v53  ;;  %v1505_v33 = vsub.f32 1.0, %v2701_v54 }
0x1357   :  { %v1503_v55 = vadd.f32 %v1502_v28, %v3202_v62 }
0x1359   :  { %2702 = vtanh.f32 %v1503_v55 }
0x1363   :  { %v2703_v57 = vpop.eup %2702 }
0x1364   :  { %1507 = vrot.lane.b32.xlu1 %v2703_v57, %s2794_s30 }
0x13d6   :  { %v1508_v38 = vpop.permute.xlu1 %1507 }
0x13d7   :  { %v1510_v41 = vmul.f32 %v1508_v38, %v1505_v33 }
0x13d9   :  { %v3229_v46 = vadd.f32 %v1513_v25, %v1510_v41 }
0x13db   :  { %v1521_v58 = vrot.slane %v3229_v46, 2  ;;  %v1620_v16 = vrot.slane %v3229_v46, 6 }
0x13dd   :  { %1522 = vrot.lane.b32.xlu0 %v1521_v58, %s2794_s30 }
0x144f   :  { %v1523_v45 = vpop.permute.xlu0 %1522 }
0x1450   :  { %2311 = vmatmul.mubr.msk.f32.vlgmr.msra.gmra.mrb[14].mxu1 %vm175_vm2, %v1523_v45 }
0x1451   :  { %2570 = vmatpush1.bf16.msra.mxu1 %v3111_v8  ;;  %1816 = vmatprep.mubr.f32.mxu1 %v2792_v44 }
0x1452   :  { %2572 = vmatprep.subr.bf16.mxu1 %v3115_v14 }
0x1455   :  { %2574 = vmatpush1.bf16.msra.mxu1 %v3117_v27 }
0x1456   :  { %2576 = vmatprep.subr.bf16.mxu1 %v3121_v22 }
0x1459   :  { %2578 = vmatpush1.bf16.msra.mxu1 %v3125_v18 }
0x145a   :  { %2580 = vmatprep.subr.bf16.mxu1 %v3129_v36 }
0x145d   :  { %2582 = vmatpush1.bf16.msra.mxu1 %v3132_v47 }
0x145e   :  { %2600 = vmatprep.subr.bf16.mxu1 %v3109_v4 }
0x1523   :  { %v1592_v37 = vpop.f32.mrb[14].mxu1 }
0x1524   :  { %v1598_v48 = vrot.slane %v1592_v37, 4  ;;  %v1594_v51 = vpop.f32.mrb[15].mxu1 }
0x1525   :  { %v1607_v63 = vadd.f32 %v1594_v51, %v3207_v13 }
0x1526   :  { %v1600_v32 = vadd.f32 %v1598_v48, %v3189_v7 }
0x1527   :  { %v1609_v2 = vrot.slane %v1607_v63, 4 }
0x1528   :  { %v2312_v59 = vmul.f32 -1.442695, %v1600_v32 }
0x152a   :  { %2704 = vpow2.f32 %v2312_v59 }
0x1534   :  { %v2705_v60 = vpop.eup %2704 }
0x1535   :  { %v1604_v61 = vadd.f32 1.0, %v2705_v60 }
0x1537   :  { %2706 = vrcp.f32 %v1604_v61 }
0x1541   :  { %v2707_v3 = vpop.eup %2706 }
0x1542   :  { %v1611_v56 = vmul.f32 %v2707_v3, %v1609_v2  ;;  %v1614_v11 = vsub.f32 1.0, %v2707_v3  ;;  %v1622_v39 = vmul.f32 %v2707_v3, %v1620_v16 }
0x1544   :  { %v1612_v35 = vadd.f32 %v1611_v56, %v3198_v9 }
0x1546   :  { %2708 = vtanh.f32 %v1612_v35 }
0x1550   :  { %v2709_v10 = vpop.eup %2708 }
0x1551   :  { %1616 = vrot.lane.b32.xlu1 %v2709_v10, %s2794_s30 }
0x15c3   :  { %v1617_v7 = vpop.permute.xlu1 %1616 }
0x15c4   :  { %v1619_v17 = vmul.f32 %v1617_v7, %v1614_v11 }
0x15c6   :  { %v3248_v20 = vadd.f32 %v1622_v39, %v1619_v17 }
0x15c8   :  { %v1630_v15 = vrot.slane %v3248_v20, 4  ;;  %v1729_v52 = vrot.slane %v3248_v20, 6 }
0x15ca   :  { %1631 = vrot.lane.b32.xlu0 %v1630_v15, %s2794_s30 }
0x163c   :  { %v1632_v21 = vpop.permute.xlu0 %1631 }
0x163d   :  { %2313 = vmatmul.mubr.msk.f32.vlgmr.msra.gmra.mrb[16].mxu0 %vm175_vm2, %v1632_v21 }
0x163e   :  { %2586 = vmatpush1.bf16.msra.mxu0 %v3111_v8  ;;  %1921 = vmatprep.mubr.f32.mxu0 %v2792_v44 }
0x163f   :  { %2588 = vmatprep.subr.bf16.mxu0 %v3115_v14 }
0x1642   :  { %2590 = vmatpush1.bf16.msra.mxu0 %v3117_v27 }
0x1643   :  { %2592 = vmatprep.subr.bf16.mxu0 %v3121_v22 }
0x1646   :  { %2594 = vmatpush1.bf16.msra.mxu0 %v3125_v18 }
0x1647   :  { %2596 = vmatprep.subr.bf16.mxu0 %v3129_v36 }
0x164a   :  { %2598 = vmatpush1.bf16.msra.mxu0 %v3132_v47 }
0x164b   :  { %2616 = vmatprep.subr.bf16.mxu0 %v3109_v4 }
0x1710   :  { %v1701_v9 = vpop.f32.mrb[16].mxu0 }
0x1711   :  { %v1707_v23 = vrot.slane %v1701_v9, 2  ;;  %v1703_v31 = vpop.f32.mrb[17].mxu0 }
0x1712   :  { %v1716_v30 = vadd.f32 %v1703_v31, %v3207_v13 }
0x1713   :  { %v1709_v24 = vadd.f32 %v1707_v23, %v3193_v19 }
0x1714   :  { %v1718_v40 = vrot.slane %v1716_v30, 2 }
0x1715   :  { %v2314_v12 = vmul.f32 -1.442695, %v1709_v24 }
0x1717   :  { %2710 = vpow2.f32 %v2314_v12 }
0x1721   :  { %v2711_v26 = vpop.eup %2710 }
0x1722   :  { %v1713_v29 = vadd.f32 1.0, %v2711_v26 }
0x1724   :  { %2712 = vrcp.f32 %v1713_v29 }
0x172e   :  { %v2713_v42 = vpop.eup %2712 }
0x172f   :  { %v1720_v43 = vmul.f32 %v2713_v42, %v1718_v40  ;;  %v1723_v4 = vsub.f32 1.0, %v2713_v42  ;;  %v1731_v53 = vmul.f32 %v2713_v42, %v1729_v52 }
0x1731   :  { %v1721_v49 = vadd.f32 %v1720_v43, %v3202_v62 }
0x1733   :  { %2714 = vtanh.f32 %v1721_v49 }
0x173d   :  { %v2715_v50 = vpop.eup %2714 }
0x173e   :  { %1725 = vrot.lane.b32.xlu1 %v2715_v50, %s2794_s30 }
0x17b0   :  { %v1726_v19 = vpop.permute.xlu1 %1725 }
0x17b1   :  { %v1728_v34 = vmul.f32 %v1726_v19, %v1723_v4 }
0x17b3   :  { %v3267_v54 = vadd.f32 %v1731_v53, %v1728_v34 }
0x17b5   :  { %v1747_v28 = vrot.slane %v3267_v54, 6 }
0x17b7   :  { %1748 = vrot.lane.b32.xlu0 %v1747_v28, %s2794_s30 }
0x1829   :  { %v1749_v25 = vpop.permute.xlu0 %1748 }
0x182a   :  { %2315 = vmatmul.mubr.msk.f32.vlgmr.msra.gmra.mrb[16].mxu1 %vm175_vm2, %v1749_v25 }
0x182b   :  { %2602 = vmatpush1.bf16.msra.mxu1 %v3111_v8  ;;  %2030 = vmatprep.mubr.f32.mxu1 %v2792_v44 }
0x182c   :  { %2604 = vmatprep.subr.bf16.mxu1 %v3115_v14 }
0x182f   :  { %2606 = vmatpush1.bf16.msra.mxu1 %v3117_v27 }
0x1830   :  { %2608 = vmatprep.subr.bf16.mxu1 %v3121_v22 }
0x1833   :  { %2610 = vmatpush1.bf16.msra.mxu1 %v3125_v18 }
0x1834   :  { %2612 = vmatprep.subr.bf16.mxu1 %v3129_v36 }
0x1837   :  { %2614 = vmatpush1.bf16.msra.mxu1 %v3132_v47 }
0x18fd   :  { %v1818_v62 = vpop.f32.mrb[16].mxu1 }
0x18fe   :  { %v1823_v55 = vadd.f32 %v1818_v62, %v3173_v1  ;;  %v1820_v57 = vpop.f32.mrb[17].mxu1 }
0x18ff   :  { %v1830_v58 = vadd.f32 %v1820_v57, %v3207_v13 }
0x1900   :  { %v2316_v33 = vmul.f32 -1.442695, %v1823_v55 }
0x1902   :  { %2716 = vpow2.f32 %v2316_v33 }
0x190c   :  { %v2717_v38 = vpop.eup %2716 }
0x190d   :  { %v1827_v41 = vadd.f32 1.0, %v2717_v38 }
0x190f   :  { %2718 = vrcp.f32 %v1827_v41 }
0x1919   :  { %v2719_v45 = vpop.eup %2718 }
0x191a   :  { %v1831_v37 = vmul.f32 %v2719_v45, %v1830_v58  ;;  %v1834_v32 = vsub.f32 1.0, %v2719_v45  ;;  %v1841_v60 = vmul.f32 %v2719_v45, %v1747_v28 }
0x191c   :  { %v1832_v48 = vadd.f32 %v1831_v37, %v3181_v5 }
0x191e   :  { %2720 = vtanh.f32 %v1832_v48 }
0x1928   :  { %v2721_v51 = vpop.eup %2720 }
0x1929   :  { %1836 = vrot.lane.b32.xlu1 %v2721_v51, %s2794_s30 }
0x199b   :  { %v1837_v59 = vpop.permute.xlu1 %1836 }
0x199c   :  { %v1839_v61 = vmul.f32 %v1837_v59, %v1834_v32 }
0x199e   :  { %v1842_v63 = vadd.f32 %v1841_v60, %v1839_v61 }
0x19a0   :  { %1844 = vrot.lane.b32.xlu0 %v1842_v63, %s2794_s30 }
0x1a12   :  { %v3285_v2 = vpop.permute.xlu0 %1844 }
0x1a13   :  { %2317 = vmatmul.mubr.msk.f32.vlgmr.msra.gmra.mrb[18].mxu0 %vm175_vm2, %v3285_v2 }
0x1a14   :  { %2618 = vmatpush1.bf16.msra.mxu0 %v3111_v8  ;;  %2139 = vmatprep.mubr.f32.mxu0 %v2792_v44 }
0x1a15   :  { %2620 = vmatprep.subr.bf16.mxu0 %v3115_v14 }
0x1a18   :  { %2622 = vmatpush1.bf16.msra.mxu0 %v3117_v27  ;;  %v1951_v27 = vrot.slane %v1842_v63, 6 }
0x1a19   :  { %2624 = vmatprep.subr.bf16.mxu0 %v3121_v22 }
0x1a1c   :  { %2626 = vmatpush1.bf16.msra.mxu0 %v3125_v18 }
0x1a1d   :  { %2628 = vmatprep.subr.bf16.mxu0 %v3129_v36 }
0x1a20   :  { %2630 = vmatpush1.bf16.msra.mxu0 %v3132_v47 }
0x1ae6   :  { %v1923_v3 = vpop.f32.mrb[18].mxu0 }
0x1ae7   :  { %v1929_v56 = vrot.slane %v1923_v3, 6  ;;  %v1925_v35 = vpop.f32.mrb[19].mxu0 }
0x1ae8   :  { %v1938_v14 = vadd.f32 %v1925_v35, %v3207_v13 }
0x1ae9   :  { %v1931_v10 = vadd.f32 %v1929_v56, %v3177_v0 }
0x1aea   :  { %v1940_v22 = vrot.slane %v1938_v14, 6 }
0x1aeb   :  { %v2318_v8 = vmul.f32 -1.442695, %v1931_v10 }
0x1aed   :  { %2722 = vpow2.f32 %v2318_v8  ;;  %v2323_v8 = vld [vmem:[%s3361_s3 + $0x4] ss:$0 sm:$0xff] }
0x1af7   :  { %v2723_v11 = vpop.eup %2722 }
0x1af8   :  { %v1935_v16 = vadd.f32 1.0, %v2723_v11 }
0x1afa   :  { %2724 = vrcp.f32 %v1935_v16 }
0x1b04   :  { %v2725_v7 = vpop.eup %2724 }
0x1b05   :  { %v1942_v18 = vmul.f32 %v2725_v7, %v1940_v22  ;;  %v1953_v39 = vmul.f32 %v2725_v7, %v1951_v27  ;;  %v1945_v17 = vsub.f32 1.0, %v2725_v7 }
0x1b07   :  { %v1943_v36 = vadd.f32 %v1942_v18, %v3185_v6  ;;  %v2795_v18 = vmov 0.0|0.0  }
0x1b08   :  { %2631 = vmatprep.subr.bf16.mxu1 %v2795_v18 }
0x1b09   :  { %2726 = vtanh.f32 %v1943_v36 }
0x1b13   :  { %v2727_v47 = vpop.eup %2726 }
0x1b14   :  { %1947 = vrot.lane.b32.xlu1 %v2727_v47, %s2794_s30 }
0x1b86   :  { %v1948_v15 = vpop.permute.xlu1 %1947 }
0x1b87   :  { %v1950_v21 = vmul.f32 %v1948_v15, %v1945_v17 }
0x1b89   :  { %v3301_v9 = vadd.f32 %v1953_v39, %v1950_v21  ;;  %v52_v39 = vld [vmem:[%s3362_s4 + $0x5] ss:$0 sm:$0xff] }
0x1b8b   :  { %v1961_v23 = vrot.slane %v3301_v9, 2  ;;  %v2060_v34 = vrot.slane %v3301_v9, 6 }
0x1b8d   :  { %1962 = vrot.lane.b32.xlu0 %v1961_v23, %s2794_s30 }
0x1bff   :  { %v1963_v31 = vpop.permute.xlu0 %1962 }
0x1c00   :  { %2319 = vmatmul.mubr.msk.f32.vlgmr.msra.gmra.mrb[18].mxu1 %vm175_vm2, %v1963_v31  ;;  %v51_v31 = vld [vmem:[%s3361_s3 + $0x5] sm:$0x3] }
0x1c01   :  { %2340 = vmatprep.mubr.msk.f32.mxu1 %vm2796_vm14, %v2792_v44 }
0x1cd3   :  { %v2032_v24 = vpop.f32.mrb[18].mxu1 }
0x1cd4   :  { %v2038_v12 = vrot.slane %v2032_v24, 4  ;;  %v2034_v26 = vpop.f32.mrb[19].mxu1 }
0x1cd5   :  { %v2047_v43 = vadd.f32 %v2034_v26, %v3207_v13 }
0x1cd6   :  { %v2040_v29 = vadd.f32 %v2038_v12, %v3173_v1 }
0x1cd7   :  { %v2049_v49 = vrot.slane %v2047_v43, 4 }
0x1cd8   :  { %v2320_v30 = vmul.f32 -1.442695, %v2040_v29 }
0x1cda   :  { %2728 = vpow2.f32 %v2320_v30 }
0x1ce4   :  { %v2729_v40 = vpop.eup %2728 }
0x1ce5   :  { %v2044_v42 = vadd.f32 1.0, %v2729_v40 }
0x1ce7   :  { %2730 = vrcp.f32 %v2044_v42 }
0x1cf1   :  { %v2731_v50 = vpop.eup %2730 }
0x1cf2   :  { %v2051_v4 = vmul.f32 %v2731_v50, %v2049_v49  ;;  %v2054_v53 = vsub.f32 1.0, %v2731_v50  ;;  %v2062_v28 = vmul.f32 %v2731_v50, %v2060_v34 }
0x1cf4   :  { %v2052_v52 = vadd.f32 %v2051_v4, %v3181_v5 }
0x1cf6   :  { %2732 = vtanh.f32 %v2052_v52 }
0x1d00   :  { %v2733_v19 = vpop.eup %2732 }
0x1d01   :  { %2056 = vrot.lane.b32.xlu1 %v2733_v19, %s2794_s30 }
0x1d73   :  { %v2057_v1 = vpop.permute.xlu1 %2056 }
0x1d74   :  { %v2059_v25 = vmul.f32 %v2057_v1, %v2054_v53 }
0x1d76   :  { %v2063_v62 = vadd.f32 %v2062_v28, %v2059_v25 }
0x1d78   :  { %v2070_v55 = vrot.slane %v2063_v62, 4  ;;  %v2169_v59 = vrot.slane %v2063_v62, 6 }
0x1d7a   :  { %2071 = vrot.lane.b32.xlu0 %v2070_v55, %s2794_s30 }
0x1d7e   :  { %1516 = vrot.lane.b32.xlu0 %v3229_v46, %s2794_s30 }
0x1d82   :  { %1734 = vrot.lane.b32.xlu0 %v3267_v54, %s2794_s30 }
0x1d86   :  { %2065 = vrot.lane.b32.xlu0 %v2063_v62, %s2794_s30 }
0x1dec   :  { %v2072_v5 = vpop.permute.xlu0 %2071 }
0x1ded   :  { %2321 = vmatmul.mubr.msk.f32.vlgmr.msra.gmra.mrb[20].mxu0 %vm175_vm2, %v2072_v5 }
0x1df0   :  { %v1517_v57 = vpop.permute.xlu0 %1516 }
0x1df1   :  { %1519 = vst.msk [vmem:[#allocation3] sm:$0xc] %vm506_vm8, %v1517_v57 }
0x1df2   :  { %1520 = vst.msk [vmem:[#allocation3 + $0xa] sm:$0xc] %vm508_vm9, %v1517_v57 }
0x1df4   :  { %v1735_v33 = vpop.permute.xlu0 %1734 }
0x1df5   :  { %1737 = vst.msk [vmem:[#allocation3] sm:$0xc0] %vm728_vm10, %v1735_v33 }
0x1df6   :  { %1738 = vst.msk [vmem:[#allocation3 + $0x2] sm:$0xc0] %vm730_vm11, %v1735_v33 }
0x1df7   :  { %1847 = vst.msk [vmem:[#allocation3 + $0x8] sm:$0x3] %vm392_vm6, %v3285_v2 }
0x1df8   :  { %1848 = vst.msk [vmem:[#allocation3 + $0x6] sm:$0x3] %vm394_vm7, %v3285_v2  ;;  %v2066_v46 = vpop.permute.xlu0 %2065 }
0x1df9   :  { %2068 = vst.msk [vmem:[#allocation3 + $0x8] sm:$0x30] %vm617_vm12, %v2066_v46 }
0x1dfa   :  { %2069 = vst.msk [vmem:[#allocation3 - $0x2] sm:$0x30] %vm619_vm13, %v2066_v46 }
0x1ec0   :  { %v2141_v54 = vpop.f32.mrb[20].mxu0 }
0x1ec1   :  { %v2147_v38 = vrot.slane %v2141_v54, 2  ;;  %v2143_v41 = vpop.f32.mrb[21].mxu0 }
0x1ec2   :  { %v2156_v51 = vadd.f32 %v2143_v41, %v3207_v13 }
0x1ec3   :  { %v2149_v58 = vadd.f32 %v2147_v38, %v3177_v0 }
0x1ec4   :  { %v2158_v32 = vrot.slane %v2156_v51, 2 }
0x1ec5   :  { %v2322_v45 = vmul.f32 -1.442695, %v2149_v58 }
0x1ec7   :  { %2734 = vpow2.f32 %v2322_v45 }
0x1ed1   :  { %v2735_v37 = vpop.eup %2734 }
0x1ed2   :  { %v2153_v48 = vadd.f32 1.0, %v2735_v37 }
0x1ed4   :  { %2736 = vrcp.f32 %v2153_v48 }
0x1ede   :  { %v2737_v60 = vpop.eup %2736 }
0x1edf   :  { %v2160_v61 = vmul.f32 %v2737_v60, %v2158_v32  ;;  %v2171_v63 = vmul.f32 %v2737_v60, %v2169_v59  ;;  %v2163_v0 = vsub.f32 1.0, %v2737_v60 }
0x1ee1   :  { %v2161_v2 = vadd.f32 %v2160_v61, %v3185_v6 }
0x1ee3   :  { %2738 = vtanh.f32 %v2161_v2 }
0x1eed   :  { %v2739_v3 = vpop.eup %2738 }
0x1eee   :  { %2165 = vrot.lane.b32.xlu1 %v2739_v3, %s2794_s30 }
0x1ef2   :  { %1625 = vrot.lane.b32.xlu1 %v3248_v20, %s2794_s30 }
0x1ef6   :  { %1956 = vrot.lane.b32.xlu1 %v3301_v9, %s2794_s30 }
0x1f60   :  { %v2166_v56 = vpop.permute.xlu1 %2165 }
0x1f61   :  { %v2168_v13 = vmul.f32 %v2166_v56, %v2163_v0 }
0x1f63   :  { %v2172_v35 = vadd.f32 %v2171_v63, %v2168_v13 }
0x1f64   :  { %v1626_v10 = vpop.permute.xlu1 %1625 }
0x1f65   :  { %1628 = vst.msk [vmem:[#allocation3] sm:$0x30] %vm617_vm12, %v1626_v10  ;;  %2174 = vrot.lane.b32.xlu1 %v2172_v35, %s2794_s30 }
0x1f66   :  { %1629 = vst.msk [vmem:[#allocation3 + $0x6] sm:$0x30] %vm619_vm13, %v1626_v10 }
0x1f68   :  { %v1957_v6 = vpop.permute.xlu1 %1956 }
0x1f69   :  { %1959 = vst.msk [vmem:[#allocation3 + $0x8] sm:$0xc] %vm506_vm8, %v1957_v6 }
0x1f6a   :  { %1960 = vst.msk [vmem:[#allocation3 + $0x2] sm:$0xc] %vm508_vm9, %v1957_v6 }
0x1fd7   :  { %v2175_v20 = vpop.permute.xlu1 %2174 }
0x1fd8   :  { %2177 = vst.msk [vmem:[#allocation3 + $0x8] sm:$0xc0] %vm728_vm10, %v2175_v20 }
0x1fd9   :  { %2178 = vst.msk [vmem:[#allocation3 - $0x6] sm:$0xc0] %vm730_vm11, %v2175_v20 }
0x1fdf   :  { %v2180_v16 = vld [vmem:[#allocation3 + $0x8] sm:$0xff] }
0x1fe0   :  { %v2179_v11 = vld [vmem:[#allocation3] sm:$0xff]  ;;  %v2186_v27 = vmul.f32 %v2323_v8, %v2180_v16 }
0x1fe1   :  { %v2185_v14 = vmul.f32 %v2323_v8, %v2179_v11 }
0x1fe2   :  { %v2190_v7 = vsel %vm175_vm2, %v2186_v27, 0.0 }
0x1fe3   :  { %v2187_v22 = vsel %vm175_vm2, %v2185_v14, 0.0  ;;  %2191 = vadd.xlane.f32.xlu1 %v2190_v7 }
0x1fe4   :  { %2188 = vadd.xlane.f32.xlu0 %v2187_v22 }
0x1ffa   :  { %2198 = vrot.lane.b32.xlu0 %v52_v39, %s2797_s14 }
0x2070   :  { %v2192_v47 = vpop.xlane.xlu1 %2191 }
0x2071   :  { %v2189_v36 = vpop.xlane.xlu0 %2188  ;;  %v2194_v15 = vadd.f32 %v2192_v47, %v52_v39 }
0x2072   :  { %v2193_v17 = vadd.f32 %v2189_v36, %v52_v39 }
0x2073   :  { %v2196_v9 = vmax.f32 %v2194_v15, 0.0 }
0x2074   :  { %v2195_v21 = vmax.f32 %v2193_v17, 0.0 }
0x2075   :  { %v2199_v44 = vpop.permute.xlu0 %2198 }
0x2076   :  { %v2632_v23 = vpack.c.bf16 %v2196_v9, %v2195_v21 }
0x2078   :  { %2633 = vmatpush3.bf16.msra.mxu1 %v2632_v23 }
0x207b   :  { %2341 = vmatmul.mubr.msk.f32.vlgmr.msra.gmra.mrb[20].mxu1 %vm2201_vm15, %v51_v31 }
0x214e   :  { %v2271_v24 = vpop.f32.mrb[20].mxu1 }
0x214f   :  { %v2272_v12 = vadd.f32 %v2271_v24, %v2199_v44  ;;  %v2342_v26 = vpop.f32.mrb[21].mxu1 }
0x2151   :  { %2276 = vst.msk [vmem:[%s3363_s5] sm:$0x3] %vm2275_vm0, %v2272_v12 }
0x2152   :  { %2281 = vsyncpa [#allocation5], 1 }
0x2153   :  { %2282 = vsyncpa [#allocation7], 1 }

</bundles_post_ra>
